<compile_context>
chip_gen: v5e
topology: v5e:2x2
jax: 0.10.0
libtpu: 0.0.40
codegen_flags: <defaults>
</compile_context>

<pallas_src>
import jax
import jax.numpy as jnp
from jax.experimental import pallas as pl
from jax.experimental.pallas import tpu as pltpu

MAX_NODES = 10
H = W = 8
HW = H * W                      # 64 spatial positions
CONV_C = 64                     # encoder output channels
KP = 16                         # im2col K (9 taps) padded to 16 (Mosaic pads lanes internally)
HID = 512                       # fc hidden width
FOUT = MAX_NODES * MAX_NODES    # 100
FOUT_PAD = 128                  # lane-dense output width
FLAT = HW * CONV_C              # 4096 flattened features ((hw, c) order)
HW_STEP = 16                    # hw positions handled per grid step
K_STEPS = HW // HW_STEP         # 4 reduction steps -> 1 MiB bf16 w1 tiles


# ---------------------------------------------------------------------------
# Fused kernel: per-step conv slab + fc1 partial accumulate; fc2+sigmoid last
# ---------------------------------------------------------------------------
def _make_fused_kernel(bp):
    def kernel(p_ref, cw_ref, cb_ref, w1_ref, b1_ref, w2_ref, b2_ref,
               o_ref, acc_ref):
        k = pl.program_id(0)

        @pl.when(k == 0)
        def _():
            acc_ref[...] = jnp.zeros_like(acc_ref)

        # ---- encoder conv for this hw-slab: (HW_STEP*bp, KP) @ (KP, C) ------
        conv = jnp.dot(p_ref[...], cw_ref[...],
                       preferred_element_type=jnp.float32)      # (HW_STEP*bp, C)
        conv = jnp.maximum(conv + cb_ref[...], 0.0)

        # ---- fc1 partial: sum_hw conv[hw] @ w1[hw-block] ---------------------
        # w1 rows are (hw, c)-ordered, so the flatten is folded into the matmul
        # decomposition and no lane-dense relayout of conv is ever built.
        part = jnp.zeros((bp, HID), jnp.float32)
        for hw in range(HW_STEP):                                # unrolled x16
            lhs = conv[hw * bp:(hw + 1) * bp, :].astype(jnp.bfloat16)   # (bp, C)
            rhs = w1_ref[hw * CONV_C:(hw + 1) * CONV_C, :]              # (C, HID)
            part = part + jnp.dot(lhs, rhs, preferred_element_type=jnp.float32)
        acc_ref[...] += part

        # ---- fc2 + sigmoid on the last reduction step ------------------------
        @pl.when(k == pl.num_programs(0) - 1)
        def _():
            h = jnp.maximum(acc_ref[...] + b1_ref[...], 0.0)            # (bp, HID) f32
            z = jnp.dot(h.astype(jnp.bfloat16), w2_ref[...],
                        preferred_element_type=jnp.float32) + b2_ref[...]
            # exact sigmoid: exp on EUP, one tiny VPU divide over (bp, 128)
            o_ref[...] = 1.0 / (1.0 + jnp.exp(-z))

    return kernel


# ---------------------------------------------------------------------------
# Wrappers
# ---------------------------------------------------------------------------
def _im2col_hw_major(x_nchw):
    """(Bp,1,H,W) -> (HW*Bp, KP) f32 patches, rows ordered hw-major / b-minor."""
    b = x_nchw.shape[0]
    xp = jnp.pad(x_nchw, ((0, 0), (0, 0), (1, 1), (1, 1)))
    cols = [xp[:, 0, di:di + H, dj:dj + W] for di in range(3) for dj in range(3)]
    patches = jnp.stack(cols, axis=-1).reshape(b, HW, 9)         # (Bp, HW, 9)
    patches = patches.transpose(1, 0, 2).reshape(HW * b, 9)      # hw-major
    return jnp.pad(patches, ((0, 0), (0, KP - 9)))


def graph_predictor_forward(x_nchw, params):
    B = x_nchw.shape[0]
    bp = ((B + 7) // 8) * 8           # pad batch to full sublane groups
    if bp != B:
        x_nchw = jnp.pad(x_nchw, ((0, bp - B), (0, 0), (0, 0), (0, 0)))
    patches = _im2col_hw_major(x_nchw)                           # (HW*bp, KP)

    out_pad = pl.pallas_call(
        _make_fused_kernel(bp),
        out_shape=jax.ShapeDtypeStruct((bp, FOUT_PAD), jnp.float32),
        grid=(K_STEPS,),
        in_specs=[
            pl.BlockSpec((HW_STEP * bp, KP), lambda k: (k, 0)),        # patch slab
            pl.BlockSpec((KP, CONV_C), lambda k: (0, 0)),              # conv_w
            pl.BlockSpec((1, CONV_C), lambda k: (0, 0)),               # conv_b
            pl.BlockSpec((HW_STEP * CONV_C, HID), lambda k: (k, 0)),   # w1 K-tile (bf16)
            pl.BlockSpec((1, HID), lambda k: (0, 0)),                  # b1
            pl.BlockSpec((HID, FOUT_PAD), lambda k: (0, 0)),           # w2 (bf16)
            pl.BlockSpec((1, FOUT_PAD), lambda k: (0, 0)),             # b2
        ],
        out_specs=pl.BlockSpec((bp, FOUT_PAD), lambda k: (0, 0)),
        scratch_shapes=[pltpu.VMEM((bp, HID), jnp.float32)],           # fc1 accumulator
        compiler_params=pltpu.CompilerParams(
            dimension_semantics=("arbitrary",)),
    )(patches, params["conv_w"], params["conv_b"],
      params["w1"], params["b1"], params["w2"], params["b2"])

    return out_pad[:B, :FOUT]


# ---------------------------------------------------------------------------
# Deterministic parameter init + demo
# ---------------------------------------------------------------------------
def init_params(key):
    k = jax.random.split(key, 6)
    conv_w9 = jax.random.normal(k[0], (9, CONV_C), jnp.float32) * (1.0 / 3.0)
    conv_w = jnp.pad(conv_w9, ((0, KP - 9), (0, 0)))             # (KP, C), zero taps
    conv_b = jax.random.normal(k[1], (1, CONV_C), jnp.float32) * 0.01
    # w1 rows are in (hw, c) order (matches the kernel's per-hw fc1 blocks).
    # To load real PyTorch weights: w1[hw*C + c, d] = w1_torch[d, c*HW + hw].
    w1 = (jax.random.normal(k[2], (FLAT, HID), jnp.float32)
          * (1.0 / jnp.sqrt(FLAT))).astype(jnp.bfloat16)
    b1 = jax.random.normal(k[3], (1, HID), jnp.float32) * 0.01
    w2_raw = (jax.random.normal(k[4], (HID, FOUT), jnp.float32)
              * (1.0 / jnp.sqrt(HID))).astype(jnp.bfloat16)
    w2 = jnp.pad(w2_raw, ((0, 0), (0, FOUT_PAD - FOUT)))         # zero-padded cols
    b2_raw = jax.random.normal(k[5], (1, FOUT), jnp.float32) * 0.01
    b2 = jnp.pad(b2_raw, ((0, 0), (0, FOUT_PAD - FOUT)))
    return dict(conv_w=conv_w, conv_b=conv_b, w1=w1, b1=b1, w2=w2, b2=b2)


if __name__ == "__main__":
    key = jax.random.PRNGKey(0)
    pkey, xkey = jax.random.split(key)
    params = init_params(pkey)

    B = 2
    x = jax.random.normal(xkey, (B, 1, H, W), jnp.float32)       # NCHW, 1 channel

    fwd = jax.jit(graph_predictor_forward)
    out = jax.block_until_ready(fwd(x, params))

    assert out.shape == (B, MAX_NODES * MAX_NODES), out.shape
    assert bool(jnp.all(jnp.isfinite(out))), "non-finite output"
    assert bool(jnp.all((out >= 0.0) & (out <= 1.0))), "sigmoid range violated"
    print("KERNEL_OK")
</pallas_src>

<mosaic_0001>
module attributes {stable_mosaic.version = 11 : i64} {
  func.func @kernel(%arg0: i32, %arg1: memref<128x16xf32, #tpu.memory_space<vmem>>, %arg2: memref<16x64xf32, #tpu.memory_space<vmem>>, %arg3: memref<1x64xf32, #tpu.memory_space<vmem>>, %arg4: memref<1024x512xbf16, #tpu.memory_space<vmem>>, %arg5: memref<1x512xf32, #tpu.memory_space<vmem>>, %arg6: memref<512x128xbf16, #tpu.memory_space<vmem>>, %arg7: memref<1x128xf32, #tpu.memory_space<vmem>>, %arg8: memref<8x128xf32, #tpu.memory_space<vmem>>, %arg9: memref<8x512xf32, #tpu.memory_space<vmem>>) attributes {dimension_semantics = [#tpu.dimension_semantics<arbitrary>], iteration_bounds = array<i64: 4>, scalar_prefetch = 0 : i64, scratch_operands = 1 : i64, tpu.core_type = #tpu.core_type<tc>, window_params = [{transform_indices = @transform_0, window_bounds = array<i64: 128, 16>}, {pipeline_mode = #tpu.pipeline_mode<synchronous>, transform_indices = @transform_1, window_bounds = array<i64: 16, 64>}, {pipeline_mode = #tpu.pipeline_mode<synchronous>, transform_indices = @transform_2, window_bounds = array<i64: 1, 64>}, {transform_indices = @transform_3, window_bounds = array<i64: 1024, 512>}, {pipeline_mode = #tpu.pipeline_mode<synchronous>, transform_indices = @transform_4, window_bounds = array<i64: 1, 512>}, {pipeline_mode = #tpu.pipeline_mode<synchronous>, transform_indices = @transform_5, window_bounds = array<i64: 512, 128>}, {pipeline_mode = #tpu.pipeline_mode<synchronous>, transform_indices = @transform_6, window_bounds = array<i64: 1, 128>}, {pipeline_mode = #tpu.pipeline_mode<synchronous>, transform_indices = @transform_7, window_bounds = array<i64: 8, 128>}]} {
    %c0_i32 = arith.constant 0 : i32
    %0 = arith.cmpi eq, %arg0, %c0_i32 : i32
    %1 = arith.extui %0 : i1 to i32
    %c0_i32_0 = arith.constant 0 : i32
    %2 = arith.cmpi ne, %1, %c0_i32_0 : i32
    scf.if %2 {
      %cst_46 = arith.constant 0.000000e+00 : f32
      %98 = vector.broadcast %cst_46 : f32 to vector<8x512xf32>
      %c0_47 = arith.constant 0 : index
      %c0_48 = arith.constant 0 : index
      %99 = vector.load %arg9[%c0_47, %c0_48] : memref<8x512xf32, #tpu.memory_space<vmem>>, vector<8x512xf32>
      tpu.vector_store %arg9[%c0_47, %c0_48], %98 {strides = array<i32>} : memref<8x512xf32, #tpu.memory_space<vmem>>, vector<8x512xf32>,
    } else {
    }
    %c0 = arith.constant 0 : index
    %c0_1 = arith.constant 0 : index
    %3 = vector.load %arg1[%c0, %c0_1] : memref<128x16xf32, #tpu.memory_space<vmem>>, vector<128x16xf32>
    %c0_2 = arith.constant 0 : index
    %c0_3 = arith.constant 0 : index
    %4 = vector.load %arg2[%c0_2, %c0_3] : memref<16x64xf32, #tpu.memory_space<vmem>>, vector<16x64xf32>
    %cst = arith.constant dense<0.000000e+00> : vector<128x64xf32>
    %5 = tpu.matmul %3, %4, %cst {dimension_numbers = #tpu.dot_dimension_numbers<[1], [0], [0], [1], [0, 0, 1, 1], [], []>} : vector<128x16xf32>, vector<16x64xf32>, vector<128x64xf32> -> vector<128x64xf32>
    %c0_4 = arith.constant 0 : index
    %c0_5 = arith.constant 0 : index
    %6 = vector.load %arg3[%c0_4, %c0_5] : memref<1x64xf32, #tpu.memory_space<vmem>>, vector<1x64xf32>
    %7 = vector.broadcast %6 : vector<1x64xf32> to vector<128x64xf32>
    %8 = arith.addf %5, %7 : vector<128x64xf32>
    %cst_6 = arith.constant 0.000000e+00 : f32
    %9 = vector.broadcast %cst_6 : f32 to vector<128x64xf32>
    %10 = arith.maximumf %8, %9 : vector<128x64xf32>
    %cst_7 = arith.constant 0.000000e+00 : f32
    %11 = vector.broadcast %cst_7 : f32 to vector<8x512xf32>
    %12 = vector.extract_strided_slice %10 {offsets = [0, 0], sizes = [8, 64], strides = [1, 1]} : vector<128x64xf32> to vector<8x64xf32>
    %13 = arith.truncf %12 : vector<8x64xf32> to vector<8x64xbf16>
    %c0_8 = arith.constant 0 : index
    %c0_9 = arith.constant 0 : index
    %14 = vector.load %arg4[%c0_8, %c0_9] : memref<1024x512xbf16, #tpu.memory_space<vmem>>, vector<64x512xbf16>
    %cst_10 = arith.constant dense<0.000000e+00> : vector<8x512xf32>
    %15 = tpu.matmul %13, %14, %cst_10 {dimension_numbers = #tpu.dot_dimension_numbers<[1], [0], [0], [1], [0, 0, 1, 1], [], []>} : vector<8x64xbf16>, vector<64x512xbf16>, vector<8x512xf32> -> vector<8x512xf32>
    %16 = arith.addf %11, %15 : vector<8x512xf32>
    %17 = vector.extract_strided_slice %10 {offsets = [8, 0], sizes = [8, 64], strides = [1, 1]} : vector<128x64xf32> to vector<8x64xf32>
    %18 = arith.truncf %17 : vector<8x64xf32> to vector<8x64xbf16>
    %c64 = arith.constant 64 : index
    %c0_11 = arith.constant 0 : index
    %19 = vector.load %arg4[%c64, %c0_11] : memref<1024x512xbf16, #tpu.memory_space<vmem>>, vector<64x512xbf16>
    %cst_12 = arith.constant dense<0.000000e+00> : vector<8x512xf32>
    %20 = tpu.matmul %18, %19, %cst_12 {dimension_numbers = #tpu.dot_dimension_numbers<[1], [0], [0], [1], [0, 0, 1, 1], [], []>} : vector<8x64xbf16>, vector<64x512xbf16>, vector<8x512xf32> -> vector<8x512xf32>
    %21 = arith.addf %16, %20 : vector<8x512xf32>
    %22 = vector.extract_strided_slice %10 {offsets = [16, 0], sizes = [8, 64], strides = [1, 1]} : vector<128x64xf32> to vector<8x64xf32>
    %23 = arith.truncf %22 : vector<8x64xf32> to vector<8x64xbf16>
    %c128 = arith.constant 128 : index
    %c0_13 = arith.constant 0 : index
    %24 = vector.load %arg4[%c128, %c0_13] : memref<1024x512xbf16, #tpu.memory_space<vmem>>, vector<64x512xbf16>
    %cst_14 = arith.constant dense<0.000000e+00> : vector<8x512xf32>
    %25 = tpu.matmul %23, %24, %cst_14 {dimension_numbers = #tpu.dot_dimension_numbers<[1], [0], [0], [1], [0, 0, 1, 1], [], []>} : vector<8x64xbf16>, vector<64x512xbf16>, vector<8x512xf32> -> vector<8x512xf32>
    %26 = arith.addf %21, %25 : vector<8x512xf32>
    %27 = vector.extract_strided_slice %10 {offsets = [24, 0], sizes = [8, 64], strides = [1, 1]} : vector<128x64xf32> to vector<8x64xf32>
    %28 = arith.truncf %27 : vector<8x64xf32> to vector<8x64xbf16>
    %c192 = arith.constant 192 : index
    %c0_15 = arith.constant 0 : index
    %29 = vector.load %arg4[%c192, %c0_15] : memref<1024x512xbf16, #tpu.memory_space<vmem>>, vector<64x512xbf16>
    %cst_16 = arith.constant dense<0.000000e+00> : vector<8x512xf32>
    %30 = tpu.matmul %28, %29, %cst_16 {dimension_numbers = #tpu.dot_dimension_numbers<[1], [0], [0], [1], [0, 0, 1, 1], [], []>} : vector<8x64xbf16>, vector<64x512xbf16>, vector<8x512xf32> -> vector<8x512xf32>
    %31 = arith.addf %26, %30 : vector<8x512xf32>
    %32 = vector.extract_strided_slice %10 {offsets = [32, 0], sizes = [8, 64], strides = [1, 1]} : vector<128x64xf32> to vector<8x64xf32>
    %33 = arith.truncf %32 : vector<8x64xf32> to vector<8x64xbf16>
    %c256 = arith.constant 256 : index
    %c0_17 = arith.constant 0 : index
    %34 = vector.load %arg4[%c256, %c0_17] : memref<1024x512xbf16, #tpu.memory_space<vmem>>, vector<64x512xbf16>
    %cst_18 = arith.constant dense<0.000000e+00> : vector<8x512xf32>
    %35 = tpu.matmul %33, %34, %cst_18 {dimension_numbers = #tpu.dot_dimension_numbers<[1], [0], [0], [1], [0, 0, 1, 1], [], []>} : vector<8x64xbf16>, vector<64x512xbf16>, vector<8x512xf32> -> vector<8x512xf32>
    %36 = arith.addf %31, %35 : vector<8x512xf32>
    %37 = vector.extract_strided_slice %10 {offsets = [40, 0], sizes = [8, 64], strides = [1, 1]} : vector<128x64xf32> to vector<8x64xf32>
    %38 = arith.truncf %37 : vector<8x64xf32> to vector<8x64xbf16>
    %c320 = arith.constant 320 : index
    %c0_19 = arith.constant 0 : index
    %39 = vector.load %arg4[%c320, %c0_19] : memref<1024x512xbf16, #tpu.memory_space<vmem>>, vector<64x512xbf16>
    %cst_20 = arith.constant dense<0.000000e+00> : vector<8x512xf32>
    %40 = tpu.matmul %38, %39, %cst_20 {dimension_numbers = #tpu.dot_dimension_numbers<[1], [0], [0], [1], [0, 0, 1, 1], [], []>} : vector<8x64xbf16>, vector<64x512xbf16>, vector<8x512xf32> -> vector<8x512xf32>
    %41 = arith.addf %36, %40 : vector<8x512xf32>
    %42 = vector.extract_strided_slice %10 {offsets = [48, 0], sizes = [8, 64], strides = [1, 1]} : vector<128x64xf32> to vector<8x64xf32>
    %43 = arith.truncf %42 : vector<8x64xf32> to vector<8x64xbf16>
    %c384 = arith.constant 384 : index
    %c0_21 = arith.constant 0 : index
    %44 = vector.load %arg4[%c384, %c0_21] : memref<1024x512xbf16, #tpu.memory_space<vmem>>, vector<64x512xbf16>
    %cst_22 = arith.constant dense<0.000000e+00> : vector<8x512xf32>
    %45 = tpu.matmul %43, %44, %cst_22 {dimension_numbers = #tpu.dot_dimension_numbers<[1], [0], [0], [1], [0, 0, 1, 1], [], []>} : vector<8x64xbf16>, vector<64x512xbf16>, vector<8x512xf32> -> vector<8x512xf32>
    %46 = arith.addf %41, %45 : vector<8x512xf32>
    %47 = vector.extract_strided_slice %10 {offsets = [56, 0], sizes = [8, 64], strides = [1, 1]} : vector<128x64xf32> to vector<8x64xf32>
    %48 = arith.truncf %47 : vector<8x64xf32> to vector<8x64xbf16>
    %c448 = arith.constant 448 : index
    %c0_23 = arith.constant 0 : index
    %49 = vector.load %arg4[%c448, %c0_23] : memref<1024x512xbf16, #tpu.memory_space<vmem>>, vector<64x512xbf16>
    %cst_24 = arith.constant dense<0.000000e+00> : vector<8x512xf32>
    %50 = tpu.matmul %48, %49, %cst_24 {dimension_numbers = #tpu.dot_dimension_numbers<[1], [0], [0], [1], [0, 0, 1, 1], [], []>} : vector<8x64xbf16>, vector<64x512xbf16>, vector<8x512xf32> -> vector<8x512xf32>
    %51 = arith.addf %46, %50 : vector<8x512xf32>
    %52 = vector.extract_strided_slice %10 {offsets = [64, 0], sizes = [8, 64], strides = [1, 1]} : vector<128x64xf32> to vector<8x64xf32>
    %53 = arith.truncf %52 : vector<8x64xf32> to vector<8x64xbf16>
    %c512 = arith.constant 512 : index
    %c0_25 = arith.constant 0 : index
    %54 = vector.load %arg4[%c512, %c0_25] : memref<1024x512xbf16, #tpu.memory_space<vmem>>, vector<64x512xbf16>
    %cst_26 = arith.constant dense<0.000000e+00> : vector<8x512xf32>
    %55 = tpu.matmul %53, %54, %cst_26 {dimension_numbers = #tpu.dot_dimension_numbers<[1], [0], [0], [1], [0, 0, 1, 1], [], []>} : vector<8x64xbf16>, vector<64x512xbf16>, vector<8x512xf32> -> vector<8x512xf32>
    %56 = arith.addf %51, %55 : vector<8x512xf32>
    %57 = vector.extract_strided_slice %10 {offsets = [72, 0], sizes = [8, 64], strides = [1, 1]} : vector<128x64xf32> to vector<8x64xf32>
    %58 = arith.truncf %57 : vector<8x64xf32> to vector<8x64xbf16>
    %c576 = arith.constant 576 : index
    %c0_27 = arith.constant 0 : index
    %59 = vector.load %arg4[%c576, %c0_27] : memref<1024x512xbf16, #tpu.memory_space<vmem>>, vector<64x512xbf16>
    %cst_28 = arith.constant dense<0.000000e+00> : vector<8x512xf32>
    %60 = tpu.matmul %58, %59, %cst_28 {dimension_numbers = #tpu.dot_dimension_numbers<[1], [0], [0], [1], [0, 0, 1, 1], [], []>} : vector<8x64xbf16>, vector<64x512xbf16>, vector<8x512xf32> -> vector<8x512xf32>
    %61 = arith.addf %56, %60 : vector<8x512xf32>
    %62 = vector.extract_strided_slice %10 {offsets = [80, 0], sizes = [8, 64], strides = [1, 1]} : vector<128x64xf32> to vector<8x64xf32>
    %63 = arith.truncf %62 : vector<8x64xf32> to vector<8x64xbf16>
    %c640 = arith.constant 640 : index
    %c0_29 = arith.constant 0 : index
    %64 = vector.load %arg4[%c640, %c0_29] : memref<1024x512xbf16, #tpu.memory_space<vmem>>, vector<64x512xbf16>
    %cst_30 = arith.constant dense<0.000000e+00> : vector<8x512xf32>
    %65 = tpu.matmul %63, %64, %cst_30 {dimension_numbers = #tpu.dot_dimension_numbers<[1], [0], [0], [1], [0, 0, 1, 1], [], []>} : vector<8x64xbf16>, vector<64x512xbf16>, vector<8x512xf32> -> vector<8x512xf32>
    %66 = arith.addf %61, %65 : vector<8x512xf32>
    %67 = vector.extract_strided_slice %10 {offsets = [88, 0], sizes = [8, 64], strides = [1, 1]} : vector<128x64xf32> to vector<8x64xf32>
    %68 = arith.truncf %67 : vector<8x64xf32> to vector<8x64xbf16>
    %c704 = arith.constant 704 : index
    %c0_31 = arith.constant 0 : index
    %69 = vector.load %arg4[%c704, %c0_31] : memref<1024x512xbf16, #tpu.memory_space<vmem>>, vector<64x512xbf16>
    %cst_32 = arith.constant dense<0.000000e+00> : vector<8x512xf32>
    %70 = tpu.matmul %68, %69, %cst_32 {dimension_numbers = #tpu.dot_dimension_numbers<[1], [0], [0], [1], [0, 0, 1, 1], [], []>} : vector<8x64xbf16>, vector<64x512xbf16>, vector<8x512xf32> -> vector<8x512xf32>
    %71 = arith.addf %66, %70 : vector<8x512xf32>
    %72 = vector.extract_strided_slice %10 {offsets = [96, 0], sizes = [8, 64], strides = [1, 1]} : vector<128x64xf32> to vector<8x64xf32>
    %73 = arith.truncf %72 : vector<8x64xf32> to vector<8x64xbf16>
    %c768 = arith.constant 768 : index
    %c0_33 = arith.constant 0 : index
    %74 = vector.load %arg4[%c768, %c0_33] : memref<1024x512xbf16, #tpu.memory_space<vmem>>, vector<64x512xbf16>
    %cst_34 = arith.constant dense<0.000000e+00> : vector<8x512xf32>
    %75 = tpu.matmul %73, %74, %cst_34 {dimension_numbers = #tpu.dot_dimension_numbers<[1], [0], [0], [1], [0, 0, 1, 1], [], []>} : vector<8x64xbf16>, vector<64x512xbf16>, vector<8x512xf32> -> vector<8x512xf32>
    %76 = arith.addf %71, %75 : vector<8x512xf32>
    %77 = vector.extract_strided_slice %10 {offsets = [104, 0], sizes = [8, 64], strides = [1, 1]} : vector<128x64xf32> to vector<8x64xf32>
    %78 = arith.truncf %77 : vector<8x64xf32> to vector<8x64xbf16>
    %c832 = arith.constant 832 : index
    %c0_35 = arith.constant 0 : index
    %79 = vector.load %arg4[%c832, %c0_35] : memref<1024x512xbf16, #tpu.memory_space<vmem>>, vector<64x512xbf16>
    %cst_36 = arith.constant dense<0.000000e+00> : vector<8x512xf32>
    %80 = tpu.matmul %78, %79, %cst_36 {dimension_numbers = #tpu.dot_dimension_numbers<[1], [0], [0], [1], [0, 0, 1, 1], [], []>} : vector<8x64xbf16>, vector<64x512xbf16>, vector<8x512xf32> -> vector<8x512xf32>
    %81 = arith.addf %76, %80 : vector<8x512xf32>
    %82 = vector.extract_strided_slice %10 {offsets = [112, 0], sizes = [8, 64], strides = [1, 1]} : vector<128x64xf32> to vector<8x64xf32>
    %83 = arith.truncf %82 : vector<8x64xf32> to vector<8x64xbf16>
    %c896 = arith.constant 896 : index
    %c0_37 = arith.constant 0 : index
    %84 = vector.load %arg4[%c896, %c0_37] : memref<1024x512xbf16, #tpu.memory_space<vmem>>, vector<64x512xbf16>
    %cst_38 = arith.constant dense<0.000000e+00> : vector<8x512xf32>
    %85 = tpu.matmul %83, %84, %cst_38 {dimension_numbers = #tpu.dot_dimension_numbers<[1], [0], [0], [1], [0, 0, 1, 1], [], []>} : vector<8x64xbf16>, vector<64x512xbf16>, vector<8x512xf32> -> vector<8x512xf32>
    %86 = arith.addf %81, %85 : vector<8x512xf32>
    %87 = vector.extract_strided_slice %10 {offsets = [120, 0], sizes = [8, 64], strides = [1, 1]} : vector<128x64xf32> to vector<8x64xf32>
    %88 = arith.truncf %87 : vector<8x64xf32> to vector<8x64xbf16>
    %c960 = arith.constant 960 : index
    %c0_39 = arith.constant 0 : index
    %89 = vector.load %arg4[%c960, %c0_39] : memref<1024x512xbf16, #tpu.memory_space<vmem>>, vector<64x512xbf16>
    %cst_40 = arith.constant dense<0.000000e+00> : vector<8x512xf32>
    %90 = tpu.matmul %88, %89, %cst_40 {dimension_numbers = #tpu.dot_dimension_numbers<[1], [0], [0], [1], [0, 0, 1, 1], [], []>} : vector<8x64xbf16>, vector<64x512xbf16>, vector<8x512xf32> -> vector<8x512xf32>
    %91 = arith.addf %86, %90 : vector<8x512xf32>
    %c0_41 = arith.constant 0 : index
    %c0_42 = arith.constant 0 : index
    %92 = vector.load %arg9[%c0_41, %c0_42] : memref<8x512xf32, #tpu.memory_space<vmem>>, vector<8x512xf32>
    %93 = arith.addf %92, %91 : vector<8x512xf32>
    %c0_43 = arith.constant 0 : index
    %c0_44 = arith.constant 0 : index
    %94 = vector.load %arg9[%c0_43, %c0_44] : memref<8x512xf32, #tpu.memory_space<vmem>>, vector<8x512xf32>
    tpu.vector_store %arg9[%c0_43, %c0_44], %93 {strides = array<i32>} : memref<8x512xf32, #tpu.memory_space<vmem>>, vector<8x512xf32>,
    %c3_i32 = arith.constant 3 : i32
    %95 = arith.cmpi eq, %arg0, %c3_i32 : i32
    %96 = arith.extui %95 : i1 to i32
    %c0_i32_45 = arith.constant 0 : i32
    %97 = arith.cmpi ne, %96, %c0_i32_45 : i32
    scf.if %97 {
      %c0_46 = arith.constant 0 : index
      %c0_47 = arith.constant 0 : index
      %98 = vector.load %arg9[%c0_46, %c0_47] : memref<8x512xf32, #tpu.memory_space<vmem>>, vector<8x512xf32>
      %c0_48 = arith.constant 0 : index
      %c0_49 = arith.constant 0 : index
      %99 = vector.load %arg5[%c0_48, %c0_49] : memref<1x512xf32, #tpu.memory_space<vmem>>, vector<1x512xf32>
      %100 = vector.broadcast %99 : vector<1x512xf32> to vector<8x512xf32>
      %101 = arith.addf %98, %100 : vector<8x512xf32>
      %cst_50 = arith.constant 0.000000e+00 : f32
      %102 = vector.broadcast %cst_50 : f32 to vector<8x512xf32>
      %103 = arith.maximumf %101, %102 : vector<8x512xf32>
      %104 = arith.truncf %103 : vector<8x512xf32> to vector<8x512xbf16>
      %c0_51 = arith.constant 0 : index
      %c0_52 = arith.constant 0 : index
      %105 = vector.load %arg6[%c0_51, %c0_52] : memref<512x128xbf16, #tpu.memory_space<vmem>>, vector<512x128xbf16>
      %cst_53 = arith.constant dense<0.000000e+00> : vector<8x128xf32>
      %106 = tpu.matmul %104, %105, %cst_53 {dimension_numbers = #tpu.dot_dimension_numbers<[1], [0], [0], [1], [0, 0, 1, 1], [], []>} : vector<8x512xbf16>, vector<512x128xbf16>, vector<8x128xf32> -> vector<8x128xf32>
      %c0_54 = arith.constant 0 : index
      %c0_55 = arith.constant 0 : index
      %107 = vector.load %arg7[%c0_54, %c0_55] : memref<1x128xf32, #tpu.memory_space<vmem>>, vector<1x128xf32>
      %108 = vector.broadcast %107 : vector<1x128xf32> to vector<8x128xf32>
      %109 = arith.addf %106, %108 : vector<8x128xf32>
      %cst_56 = arith.constant 0.000000e+00 : f32
      %110 = vector.broadcast %cst_56 : f32 to vector<8x128xf32>
      %111 = arith.subf %110, %109 : vector<8x128xf32>
      %112 = math.exp %111 : vector<8x128xf32>
      %cst_57 = arith.constant 1.000000e+00 : f32
      %113 = vector.broadcast %cst_57 : f32 to vector<8x128xf32>
      %114 = arith.addf %113, %112 : vector<8x128xf32>
      %cst_58 = arith.constant 1.000000e+00 : f32
      %115 = vector.broadcast %cst_58 : f32 to vector<8x128xf32>
      %116 = arith.divf %115, %114 : vector<8x128xf32>
      %c0_59 = arith.constant 0 : index
      %c0_60 = arith.constant 0 : index
      %117 = vector.load %arg8[%c0_59, %c0_60] : memref<8x128xf32, #tpu.memory_space<vmem>>, vector<8x128xf32>
      tpu.vector_store %arg8[%c0_59, %c0_60], %116 {strides = array<i32>} : memref<8x128xf32, #tpu.memory_space<vmem>>, vector<8x128xf32>,
    } else {
    }
    return
  }
  func.func @transform_0(%arg0: i32) -> (i32, i32) {
    %c0_i32 = arith.constant 0 : i32
    %c0_i32_0 = arith.constant 0 : i32
    return %arg0, %c0_i32 : i32, i32
  }
  func.func @transform_1(%arg0: i32) -> (i32, i32) {
    %c0_i32 = arith.constant 0 : i32
    %c0_i32_0 = arith.constant 0 : i32
    %c0_i32_1 = arith.constant 0 : i32
    return %c0_i32, %c0_i32_0 : i32, i32
  }
  func.func @transform_2(%arg0: i32) -> (i32, i32) {
    %c0_i32 = arith.constant 0 : i32
    %c0_i32_0 = arith.constant 0 : i32
    %c0_i32_1 = arith.constant 0 : i32
    return %c0_i32, %c0_i32_0 : i32, i32
  }
  func.func @transform_3(%arg0: i32) -> (i32, i32) {
    %c0_i32 = arith.constant 0 : i32
    %c0_i32_0 = arith.constant 0 : i32
    return %arg0, %c0_i32 : i32, i32
  }
  func.func @transform_4(%arg0: i32) -> (i32, i32) {
    %c0_i32 = arith.constant 0 : i32
    %c0_i32_0 = arith.constant 0 : i32
    %c0_i32_1 = arith.constant 0 : i32
    return %c0_i32, %c0_i32_0 : i32, i32
  }
  func.func @transform_5(%arg0: i32) -> (i32, i32) {
    %c0_i32 = arith.constant 0 : i32
    %c0_i32_0 = arith.constant 0 : i32
    %c0_i32_1 = arith.constant 0 : i32
    return %c0_i32, %c0_i32_0 : i32, i32
  }
  func.func @transform_6(%arg0: i32) -> (i32, i32) {
    %c0_i32 = arith.constant 0 : i32
    %c0_i32_0 = arith.constant 0 : i32
    %c0_i32_1 = arith.constant 0 : i32
    return %c0_i32, %c0_i32_0 : i32, i32
  }
  func.func @transform_7(%arg0: i32) -> (i32, i32) {
    %c0_i32 = arith.constant 0 : i32
    %c0_i32_0 = arith.constant 0 : i32
    %c0_i32_1 = arith.constant 0 : i32
    return %c0_i32, %c0_i32_0 : i32, i32
  }
}

</mosaic_0001>

<bundles_post_ra>
// kernel: graph_predictor_forward.1
= control target key start
LH: loop header
LB: loop body
LE: loop exit
PB: predicated region body
PF: predicated region fallthrough
CT: control target
= control target key end

     0   :  { %12 = vsyncpa [#allocation4], 0  ;;  %s6413_s0 = inlined_call_operand.vmem [shape: f32[512,16], index: 0, kind: input, shape index: {}]   ;;  %s6414_s1 = inlined_call_operand.hbm [shape: f32[16,64], index: 1, kind: input, shape index: {}]   ;;  %s6415_s2 = inlined_call_operand.hbm [shape: f32[1,64], index: 2, kind: input, shape index: {}]   ;;  %s6416_s3 = inlined_call_operand.hbm [shape: bf16[4096,512], index: 3, kind: input, shape index: {}]   ;;  %s6417_s4 = inlined_call_operand.hbm [shape: f32[1,512], index: 4, kind: input, shape index: {}]   ;;  %s6418_s5 = inlined_call_operand.hbm [shape: bf16[512,128], index: 5, kind: input, shape index: {}]   ;;  %s6419_s6 = inlined_call_operand.hbm [shape: f32[1,128], index: 6, kind: input, shape index: {}]   ;;  %s6420_s7 = inlined_call_operand.vmem [shape: f32[8,128], index: 7, kind: output, shape index: {}]  }
   0x1   :  { %13 = vsyncpa [#allocation6], 0 }
   0x2   :  { %14 = vsyncpa [#allocation10], 0  ;;  %s5441_s24 = smov 0   ;;  %s5443_s25 = smov 0  }
   0x3   :  { %s5445_s26 = smov 0   ;;  %s5447_s27 = smov 0  }
   0x4 LB: > { %s5460_s28 = sadd.s32 4294967295, %s5387_s27   ;;  %p108_p0 = scmp.ne.s32.totalorder %s5379_s25, %s5375_s24  ;;  %s5387_s27 = sphi %s5447_s27, %s6428_s27   ;;  %s5383_s26 = sphi %s5445_s26, %s6427_s26   ;;  %s5379_s25 = sphi %s5443_s25, %s6426_s25   ;;  %s5375_s24 = sphi %s5441_s24, %s6425_s24  }
   0x5   : > { %p109_p1 = scmp.eq.s32.totalorder %s5460_s28, 0  ;;  %p3507_p2 = scmp.ge.s32.totalorder %s5387_s27, 1 }
   0x6   : > { %p203_p3 = scmp.lt.s32.totalorder %s5387_s27, 5  ;;  %p3508_p4 = scmp.ne.s32.totalorder %s5460_s28, 0 }
   0x7   : > { %p5469_p5 = por %p109_p1, %p108_p0  ;;  %s214_s9 = sshll.u32 %s6414_s1, 4  ;;  %s215_s9 = int_to_ptr.hbm [resolvable:$true] %s214_s9 }
   0x8   : > { %p5476_p6 = pnand %p3507_p2, %p203_p3  ;;  %s5389_s11 = smov [#allocation3]  }
   0x9   : > { %s216_s12 = sshll.u32 %s5389_s11, 4  ;;  %s229_s16 = sshll.u32 %s6415_s2, 4  ;;  %s217_s12 = int_to_ptr.vmem [resolvable:$true] %s216_s12  ;;  %s230_s16 = int_to_ptr.hbm [resolvable:$true] %s229_s16 }
   0xa   : > { %p5075_p7 = pneg %p5476_p6  ;;  %s5390_s17 = smov 128  }
   0xb   : > { %s5391_s18 = smov 8   ;;  %s5392_s19 = smov [#allocation5]  }
   0xc   : > { %p5484_p8 = pnand %p5075_p7, %p109_p1  ;;  %s231_s20 = sshll.u32 %s5392_s19, 4  ;;  %s232_s20 = int_to_ptr.vmem [resolvable:$true] %s231_s20 }
   0xd   : > { %s252_s23 = sshll.u32 %s6418_s5, 4  ;;  %s5393_s24 = smov [#allocation9]   ;;  %s253_s23 = int_to_ptr.hbm [resolvable:$true] %s252_s23 }
   0xe   : > { %5078 = dma.hbm_to_vmem [thread:$0]  (!%p5484_p8), %s215_s9, 256, %s217_s12, [#allocation4], %s5390_s17, %s5390_s17, %s5391_s18  }
   0xf   : > { %5081 = dma.hbm_to_vmem [thread:$0]  (!%p5484_p8), %s230_s16, 16, %s232_s20, [#allocation6]  }
  0x10   : > { %s254_s30 = sshll.u32 %s5393_s24, 4  ;;  %s241_s9 = sshll.u32 %s6417_s4, 4  ;;  %s255_s30 = int_to_ptr.vmem [resolvable:$true] %s254_s30  ;;  %s242_s9 = int_to_ptr.hbm [resolvable:$true] %s241_s9 }
  0x11   : > { %s5394_s12 = smov 64   ;;  %s5395_s14 = smov 4  }
  0x12   : > { %5087 = dma.hbm_to_vmem [thread:$0]  (!%p5484_p8), %s253_s23, 4096, %s255_s30, [#allocation10], %s5394_s12, %s5394_s12, %s5395_s14  }
  0x13   : > { %s5396_s15 = smov [#allocation8]   ;;  %s267_s19 = sshll.u32 %s6419_s6, 4  ;;  %s268_s19 = int_to_ptr.hbm [resolvable:$true] %s267_s19 }
  0x14   : > { %s243_s16 = sshll.u32 %s5396_s15, 4  ;;  %s5397_s20 = smov [#allocation11]   ;;  %s244_s16 = int_to_ptr.vmem [resolvable:$true] %s243_s16 }
  0x15   : > { %5084 = dma.hbm_to_vmem [thread:$0]  (!%p5484_p8), %s242_s9, 64, %s244_s16, [#allocation6]  }
  0x16   : > { %s269_s21 = sshll.u32 %s5397_s20, 4  ;;  %s5509_s22 = sadd.s32 1, %s5387_s27   ;;  %s270_s21 = int_to_ptr.vmem [resolvable:$true] %s269_s21 }
  0x17   : > { %5090 = dma.hbm_to_vmem [thread:$0]  (!%p5484_p8), %s268_s19, 16, %s270_s21, [#allocation10]  }
  0x18   : > { %s92_s23 = ssub.s32 %s5387_s27, %s5509_s22  ;;  %s95_s24 = sadd.s32 1, %s5383_s26 }
  0x19   : > { %p93_p9 = scmp.eq.s32.totalorder %s92_s23, 0  ;;  %p102_p10 = scmp.ne.s32.totalorder %s5383_s26, %s5379_s25 }
  0x1a   : > { %p103_p11 = scmp.eq.s32.totalorder %s5387_s27, 0  ;;  %p5100_p12 = scmp.lt.s32.totalorder %s5387_s27, 4 }
  0x1b   : > { %s5521_s30 = scalar_select %p93_p9, %s5383_s26, %s95_s24  }
  0x1c   : > { %p104_p13 = por %p103_p11, %p102_p10  ;;  %s289_s8 = sand.u32 1, %s5387_s27  }
  0x1d   : > { %s291_s11 = sand.u32 1, %s5383_s26   ;;  %s4764_s12 = sshll.u32 %s5387_s27, 11 }
  0x1e   : > { %s3514_s9 = sshll.u32 %s291_s11, 11  ;;  %s299_s13 = scalar_lea.hbm %s6416_s3, %s4764_s12 }
  0x1f   : > { %s300_s16 = sshll.u32 %s299_s13, 4  ;;  %s293_s17 = scalar_lea.vmem [#allocation7], %s3514_s9  ;;  %s301_s16 = int_to_ptr.hbm [resolvable:$true] %s300_s16 }
  0x20   : > { %s302_s18 = sshll.u32 %s293_s17, 4  ;;  %p5531_p0 = pnand %p5100_p12, %p104_p13  ;;  %s303_s18 = int_to_ptr.vmem [resolvable:$true] %s302_s18 }
  0x21   : > { %s290_s20 = scalar_lea.sflag [#allocation4], %s289_s8  ;;  %s5307_s21 = sshra.s32 %s301_s16, 4  ;;  %s5308_s21 = int_to_ptr.hbm [resolvable:$true] %s5307_s21 }
  0x22   : > { %s5309_s23 = scalar_lea.hbm %s5308_s21, 2048  ;;  %p5311_p3 = pneg %p5531_p0 }
  0x23   : > { %p5310_p2 = scmp.ne.s32.totalorder %s5308_s21, %s5309_s23  ;;  %s5314_s9 = scalar_lea.hbm %s6416_s3, 8192 }
  0x24   : > { %p5315_p9 = scmp.lt.s32.totalorder %s5308_s21, %s6416_s3  ;;  %p5316_p10 = scmp.lt.s32.totalorder %s5314_s9, %s5309_s23 }
  0x25   : > { %p5312_p7 = pnand %p5311_p3, %p5310_p2 }
  0x26   : > { %p5317_p11 = por %p5316_p10, %p5315_p9 }
  0x27   : > { %p5313_p8 = pneg %p5312_p7 }
  0x29   : > { %p5318_p12 = pnand %p5317_p11, %p5313_p8 }
  0x2b   : > { %5321 = shalt.err (!%p5318_p12)
}
  0x2c   : > { %s5398_s8 = smov 256   ;;  %s5399_s14 = smov 16  }
  0x2d   : > { %5094 = dma.hbm_to_vmem [thread:$0]  (!%p5531_p0), %s301_s16, 32768, %s303_s18, %s290_s20, %s5398_s8, %s5398_s8, %s5399_s14  }
  0x2e   : > { %314 = sbr.rel (%p5476_p6) target bundleno = 831 (0x33f), region = 48 }
  0x33   : > { %5354 = dma.done.wait (%p109_p1), [#allocation4], 256  }
  0x34   : > { %5356 = vsyncadd (%p109_p1), [#allocation4], 4294967040 }
  0x35   : > { %5358 = dma.done.wait (%p109_p1), [#allocation6], 16  }
  0x36   : > { %5360 = vsyncadd (%p109_p1), [#allocation6], 4294967280  ;;  %s326_s15 = sand.u32 1, %s5460_s28   ;;  %s328_s13 = sand.u32 1, %s5379_s25  }
  0x37   : > { %s3521_s16 = sshll.u32 %s328_s13, 11  ;;  %s327_s10 = scalar_lea.sflag [#allocation4], %s326_s15 }
  0x38   : > { %s5557_s17 = scalar_lea.vmem [#allocation7], %s3521_s16 }
  0x39   : > { %5362 = dma.done.wait (%p5469_p5), %s327_s10, 32768  }
  0x3a   : > { %5364 = vsyncadd (%p5469_p5), %s327_s10, 4294934528 }
  0x3b   : > { %5366 = dma.done.wait (%p109_p1), [#allocation6], 64  }
  0x3c   : > { %5368 = vsyncadd (%p109_p1), [#allocation6], 4294967232 }
  0x3d   : > { %5370 = dma.done.wait (%p109_p1), [#allocation10], 4112  }
  0x3e   : > { %5372 = vsyncadd (%p109_p1), [#allocation10], 4294963184  ;;  %s3525_s18 = sshll.u32 %s5460_s28, 4 }
  0x3f   : > { %p378_p6 = scmp.lt.s32.totalorder %s3525_s18, 63  ;;  %388 = sbr.rel (%p3508_p4) target bundleno = 73 (0x49), region = 76 }
  0x41   : > { %s6430_s18 = smov (!%p378_p6, %s3525_s18), 63 }
  0x42   : > { %s3526_s19 = sshll.u32 %s6430_s18, 3 }
  0x43   : > { %s5575_s21 = scalar_lea.vmem %s6413_s0, %s3526_s19 }
  0x44   : > { %v5400_v0 = vmov 0.0  }
  0x45   : > { %389 = vst [vmem:[#allocation2 + $0x10] sm:$0xff] %v5400_v0 }
  0x46   : > { %390 = vst [vmem:[#allocation2] sm:$0xff] %v5400_v0 }
  0x47   : > { %391 = vst [vmem:[#allocation2 + $0x18] sm:$0xff] %v5400_v0 }
  0x48   : > { %392 = vst [vmem:[#allocation2 + $0x8] sm:$0xff] %v5400_v0 }
  0x49 PF: > { %v410_v1 = vld [vmem:[#allocation3 + $0x8] sm:$0xff]  ;;  %v409_v2 = vld [vmem:[#allocation3] sm:$0xff]  ;;  %vm415_vm0 = vcmask 130048   ;;  %v395_v5 = vld [vmem:[%s5575_s21 + $0x10] sm:$0xff]  ;;  %vm659_vm1 = vcmask 523264   ;;  %p4632_p1 = scmp.ne.s32.totalorder %s5460_s28, 3 }
  0x4a   : > { %478 = vmatpush.msra.mxu0 %v410_v1  ;;  %v393_v3 = vld [vmem:[%s5575_s21] sm:$0xff]  ;;  %v394_v4 = vld [vmem:[%s5575_s21 + $0x8] sm:$0xff]  ;;  %v396_v6 = vld [vmem:[%s5575_s21 + $0x18] sm:$0xff] }
  0x4b   : > { %v397_v7 = vld [vmem:[%s5575_s21 + $0x20] sm:$0xff]  ;;  %v398_v8 = vld [vmem:[%s5575_s21 + $0x28] sm:$0xff]  ;;  %v399_v9 = vld [vmem:[%s5575_s21 + $0x30] sm:$0xff] }
  0x4c   : > { %479 = vmatpush.msra.mxu0 %v409_v2  ;;  %v400_v10 = vld [vmem:[%s5575_s21 + $0x38] sm:$0xff]  ;;  %v401_v11 = vld [vmem:[%s5575_s21 + $0x40] sm:$0xff]  ;;  %v402_v12 = vld [vmem:[%s5575_s21 + $0x48] sm:$0xff] }
  0x4d   : > { %3528 = vmatmul.msk.f32.vlgmr.msra.gmra.mxu0 %vm415_vm0, %v393_v3  ;;  %v403_v13 = vld [vmem:[%s5575_s21 + $0x50] sm:$0xff]  ;;  %v4795_v15 = vld [vmem:[%s5557_s17 + $0xec] sm:$0xf0]  ;;  %v3596_v18 = vld [vmem:[%s5557_s17 + $0xf0] sm:$0xf0] }
  0x4e   : > { %v3594_v14 = vld [vmem:[%s5557_s17 + $0xe0] sm:$0xf]  ;;  %v4793_v16 = vld [vmem:[%s5557_s17 + $0xe4] sm:$0xf]  ;;  %v3602_v19 = vld [vmem:[%s5557_s17 + $0xe8] sm:$0xf] }
  0x4f   : > { %v3595_v17 = vor.u32 %v4795_v15, %v3594_v14  ;;  %v4796_v20 = vld [vmem:[%s5557_s17 + $0xf4] sm:$0xf0]  ;;  %v3599_v21 = vor.u32 %v4793_v16, %v3596_v18  ;;  %v3578_v23 = vld [vmem:[%s5557_s17 + $0xc0] sm:$0xf]  ;;  %v4791_v24 = vld [vmem:[%s5557_s17 + $0xcc] sm:$0xf0] }
  0x50   : > { %v3603_v22 = vor.u32 %v4796_v20, %v3602_v19  ;;  %v4789_v25 = vld [vmem:[%s5557_s17 + $0xc4] sm:$0xf]  ;;  %v3579_v27 = vor.u32 %v4791_v24, %v3578_v23  ;;  %v3580_v28 = vld [vmem:[%s5557_s17 + $0xd0] sm:$0xf0]  ;;  %v3586_v29 = vld [vmem:[%s5557_s17 + $0xc8] sm:$0xf] }
  0x51   : > { %667 = vmatpush.bf16.msra.mxu1 %v3595_v17  ;;  %680 = vmatpush.bf16.msra.mxu2 %v3599_v21  ;;  %v404_v26 = vld [vmem:[%s5575_s21 + $0x58] sm:$0xff]  ;;  %v3583_v30 = vor.u32 %v4789_v25, %v3580_v28  ;;  %v4792_v31 = vld [vmem:[%s5557_s17 + $0xd4] sm:$0xf0]  ;;  %v3562_v33 = vld [vmem:[%s5557_s17 + $0xa0] sm:$0xf] }
  0x52   : > { %693 = vmatpush.bf16.msra.mxu3 %v3603_v22  ;;  %v3587_v32 = vor.u32 %v4792_v31, %v3586_v29  ;;  %v4787_v34 = vld [vmem:[%s5557_s17 + $0xac] sm:$0xf0]  ;;  %v4785_v35 = vld [vmem:[%s5557_s17 + $0xa4] sm:$0xf]  ;;  %v3564_v37 = vld [vmem:[%s5557_s17 + $0xb0] sm:$0xf0] }
  0x53   : > { %v3563_v36 = vor.u32 %v4787_v34, %v3562_v33  ;;  %v3570_v38 = vld [vmem:[%s5557_s17 + $0xa8] sm:$0xf]  ;;  %v4788_v39 = vld [vmem:[%s5557_s17 + $0xb4] sm:$0xf0]  ;;  %v3567_v40 = vor.u32 %v4785_v35, %v3564_v37  ;;  %v3546_v42 = vld [vmem:[%s5557_s17 + $0x80] sm:$0xf] }
  0x54   : > { %v3571_v41 = vor.u32 %v4788_v39, %v3570_v38  ;;  %v4783_v43 = vld [vmem:[%s5557_s17 + $0x8c] sm:$0xf0]  ;;  %v4781_v44 = vld [vmem:[%s5557_s17 + $0x84] sm:$0xf]  ;;  %v3548_v46 = vld [vmem:[%s5557_s17 + $0x90] sm:$0xf0] }
  0x55   : > { %3529 = vmatmul.msk.f32.gmra.mxu0 %vm415_vm0, %v394_v4  ;;  %668 = vmatpush.bf16.msra.mxu1 %v3579_v27  ;;  %v3547_v45 = vor.u32 %v4783_v43, %v3546_v42  ;;  %v3554_v47 = vld [vmem:[%s5557_s17 + $0x88] sm:$0xf]  ;;  %v4784_v48 = vld [vmem:[%s5557_s17 + $0x94] sm:$0xf0]  ;;  %v3551_v49 = vor.u32 %v4781_v44, %v3548_v46  ;;  %v3662_v51 = vld [vmem:[%s5557_s17 + $0x60] sm:$0xf] }
  0x56   : > { %681 = vmatpush.bf16.msra.mxu2 %v3583_v30  ;;  %694 = vmatpush.bf16.msra.mxu3 %v3587_v32  ;;  %v3555_v50 = vor.u32 %v4784_v48, %v3554_v47  ;;  %v4779_v52 = vld [vmem:[%s5557_s17 + $0x6c] sm:$0xf0]  ;;  %v4777_v53 = vld [vmem:[%s5557_s17 + $0x64] sm:$0xf]  ;;  %v3664_v55 = vld [vmem:[%s5557_s17 + $0x70] sm:$0xf0] }
  0x57   : > { %v3663_v54 = vor.u32 %v4779_v52, %v3662_v51  ;;  %v4794_v56 = vld [vmem:[%s5557_s17 + $0xec] sm:$0xf]  ;;  %v3604_v57 = vld [vmem:[%s5557_s17 + $0xf8] sm:$0xf0]  ;;  %v3667_v58 = vor.u32 %v4777_v53, %v3664_v55  ;;  %v3646_v60 = vld [vmem:[%s5557_s17 + $0x40] sm:$0xf] }
  0x58   : > { %v3607_v59 = vor.u32 %v4794_v56, %v3604_v57  ;;  %v4775_v61 = vld [vmem:[%s5557_s17 + $0x4c] sm:$0xf0]  ;;  %v4773_v62 = vld [vmem:[%s5557_s17 + $0x44] sm:$0xf]  ;;  %v3648_v1 = vld [vmem:[%s5557_s17 + $0x50] sm:$0xf0] }
  0x59   : > { %669 = vmatpush.bf16.msra.mxu1 %v3563_v36  ;;  %v405_v63 = vld [vmem:[%s5575_s21 + $0x60] sm:$0xff]  ;;  %v3647_v0 = vor.u32 %v4775_v61, %v3646_v60  ;;  %v3651_v3 = vor.u32 %v4773_v62, %v3648_v1  ;;  %v3588_v4 = vld [vmem:[%s5557_s17 + $0xd8] sm:$0xf0]  ;;  %v3614_v18 = vld [vmem:[%s5557_s17] sm:$0xf] }
  0x5a   : > { %682 = vmatpush.bf16.msra.mxu2 %v3567_v40  ;;  %695 = vmatpush.bf16.msra.mxu3 %v3571_v41  ;;  %v4790_v2 = vld [vmem:[%s5557_s17 + $0xcc] sm:$0xf]  ;;  %v3572_v16 = vld [vmem:[%s5557_s17 + $0xb8] sm:$0xf0]  ;;  %v4767_v19 = vld [vmem:[%s5557_s17 + $0xc] sm:$0xf0] }
  0x5b   : > { %v4786_v15 = vld [vmem:[%s5557_s17 + $0xac] sm:$0xf]  ;;  %v4765_v20 = vld [vmem:[%s5557_s17 + $0x4] sm:$0xf]  ;;  %v3615_v21 = vor.u32 %v4767_v19, %v3614_v18  ;;  %v3616_v22 = vld [vmem:[%s5557_s17 + $0x10] sm:$0xf0] }
  0x5c   : > { %v3575_v17 = vor.u32 %v4786_v15, %v3572_v16  ;;  %v4782_v23 = vld [vmem:[%s5557_s17 + $0x8c] sm:$0xf]  ;;  %v3556_v24 = vld [vmem:[%s5557_s17 + $0x98] sm:$0xf0]  ;;  %v3619_v25 = vor.u32 %v4765_v20, %v3616_v22  ;;  %v3730_v35 = vld [vmem:[%s5557_s17 + $0x160] sm:$0xf] }
  0x5d   : > { %3530 = vmatmul.msk.f32.gmra.mxu0 %vm415_vm0, %v395_v5  ;;  %670 = vmatpush.bf16.msra.mxu1 %v3547_v45  ;;  %v3591_v5 = vor.u32 %v4790_v2, %v3588_v4  ;;  %v406_v27 = vld [vmem:[%s5575_s21 + $0x68] sm:$0xff]  ;;  %v407_v29 = vld [vmem:[%s5575_s21 + $0x70] sm:$0xff]  ;;  %v4778_v33 = vld [vmem:[%s5557_s17 + $0x6c] sm:$0xf] }
  0x5e   : > { %683 = vmatpush.bf16.msra.mxu2 %v3551_v49  ;;  %696 = vmatpush.bf16.msra.mxu3 %v3555_v50  ;;  %v5659_v30 = vld [vmem:[#allocation5] ss:$0 sm:$0xff]  ;;  %v4811_v36 = vld [vmem:[%s5557_s17 + $0x16c] sm:$0xf0]  ;;  %v3670_v37 = vld [vmem:[%s5557_s17 + $0x68] sm:$0xf] }
  0x5f   : > { %v3672_v34 = vld [vmem:[%s5557_s17 + $0x78] sm:$0xf0]  ;;  %v4780_v38 = vld [vmem:[%s5557_s17 + $0x74] sm:$0xf0]  ;;  %v4774_v41 = vld [vmem:[%s5557_s17 + $0x4c] sm:$0xf]  ;;  %v3731_v45 = vor.u32 %v4811_v36, %v3730_v35 }
  0x60   : > { %v3675_v40 = vor.u32 %v4778_v33, %v3672_v34  ;;  %v3986_v42 = vld [vmem:[%s5557_s17 + $0x340] sm:$0xf]  ;;  %v4871_v43 = vld [vmem:[%s5557_s17 + $0x34c] sm:$0xf0]  ;;  %v3671_v46 = vor.u32 %v4780_v38, %v3670_v37  ;;  %v3656_v47 = vld [vmem:[%s5557_s17 + $0x58] sm:$0xf0] }
  0x61   : > { %706 = vmatpush.bf16.msrb.mxu1 %v3607_v59  ;;  %v3714_v48 = vld [vmem:[%s5557_s17 + $0x140] sm:$0xf]  ;;  %v408_v49 = vld [vmem:[%s5575_s21 + $0x78] sm:$0xff]  ;;  %v4807_v50 = vld [vmem:[%s5557_s17 + $0x14c] sm:$0xf0]  ;;  %v3987_v53 = vor.u32 %v4871_v43, %v3986_v42  ;;  %v3659_v55 = vor.u32 %v4774_v41, %v3656_v47 }
  0x62   : > { %802 = vmatpush.bf16.msrb.mxu2 %v3663_v54  ;;  %815 = vmatpush.bf16.msrb.mxu3 %v3667_v58  ;;  %v3654_v51 = vld [vmem:[%s5557_s17 + $0x48] sm:$0xf]  ;;  %v4776_v52 = vld [vmem:[%s5557_s17 + $0x54] sm:$0xf0]  ;;  %v3970_v56 = vld [vmem:[%s5557_s17 + $0x320] sm:$0xf]  ;;  %v3715_v58 = vor.u32 %v4807_v50, %v3714_v48 }
  0x63   : > { %v4867_v57 = vld [vmem:[%s5557_s17 + $0x32c] sm:$0xf0]  ;;  %v3655_v59 = vor.u32 %v4776_v52, %v3654_v51  ;;  %v4770_v60 = vld [vmem:[%s5557_s17 + $0x2c] sm:$0xf]  ;;  %v3640_v61 = vld [vmem:[%s5557_s17 + $0x38] sm:$0xf0] }
  0x64   : > { %v3698_v62 = vld [vmem:[%s5557_s17 + $0x120] sm:$0xf]  ;;  %v4772_v1 = vld [vmem:[%s5557_s17 + $0x34] sm:$0xf0]  ;;  %v3971_v2 = vor.u32 %v4867_v57, %v3970_v56  ;;  %v3643_v4 = vor.u32 %v4770_v60, %v3640_v61  ;;  %v3722_v37 = vld [vmem:[%s5557_s17 + $0x148] sm:$0xf] }
  0x65   : > { %3531 = vmatmul.msk.f32.gmra.mxu0 %vm415_vm0, %v396_v6  ;;  %v4002_v6 = vld [vmem:[%s5557_s17 + $0x360] sm:$0xf]  ;;  %707 = vmatpush.bf16.msrb.mxu1 %v3591_v5  ;;  %v4808_v38 = vld [vmem:[%s5557_s17 + $0x154] sm:$0xf0]  ;;  %v4805_v41 = vld [vmem:[%s5557_s17 + $0x144] sm:$0xf] }
  0x66   : > { %803 = vmatpush.bf16.msrb.mxu2 %v3647_v0  ;;  %816 = vmatpush.bf16.msrb.mxu3 %v3651_v3  ;;  %v3638_v0 = vld [vmem:[%s5557_s17 + $0x28] sm:$0xf]  ;;  %v3954_v5 = vld [vmem:[%s5557_s17 + $0x300] sm:$0xf]  ;;  %v3716_v42 = vld [vmem:[%s5557_s17 + $0x150] sm:$0xf0] }
  0x67   : > { %v4070_v16 = vld [vmem:[%s5557_s17 + $0x3e0] sm:$0xf]  ;;  %v4883_v48 = vld [vmem:[%s5557_s17 + $0x3ac] sm:$0xf0]  ;;  %v3706_v50 = vld [vmem:[%s5557_s17 + $0x128] sm:$0xf] }
  0x68   : > { %v4038_v47 = vld [vmem:[%s5557_s17 + $0x3a0] sm:$0xf]  ;;  %v4804_v51 = vld [vmem:[%s5557_s17 + $0x134] sm:$0xf0]  ;;  %v4802_v52 = vld [vmem:[%s5557_s17 + $0x12c] sm:$0xf] }
  0x69   : > { %708 = vmatpush.bf16.msrb.mxu1 %v3575_v17  ;;  %v4891_v17 = vld [vmem:[%s5557_s17 + $0x3ec] sm:$0xf0]  ;;  %v3700_v56 = vld [vmem:[%s5557_s17 + $0x130] sm:$0xf0]  ;;  %v4039_v57 = vor.u32 %v4883_v48, %v4038_v47  ;;  %v3707_v61 = vor.u32 %v4804_v51, %v3706_v50  ;;  %v4813_v47 = vld [vmem:[%s5557_s17 + $0x184] sm:$0xf] }
  0x6a   : > { %v3752_v48 = vld [vmem:[%s5557_s17 + $0x190] sm:$0xf0]  ;;  %v3758_v51 = vld [vmem:[%s5557_s17 + $0x188] sm:$0xf] }
  0x6d   : > { %3532 = vmatmul.msk.f32.gmra.mxu0 %vm415_vm0, %v397_v7  ;;  %v4875_v7 = vld [vmem:[%s5557_s17 + $0x36c] sm:$0xf0] }
  0x75   : > { %3533 = vmatmul.msk.f32.gmra.mxu0 %vm415_vm0, %v398_v8  ;;  %v3630_v8 = vld [vmem:[%s5557_s17 + $0x20] sm:$0xf] }
  0x7d   : > { %3534 = vmatmul.msk.f32.gmra.mxu0 %vm415_vm0, %v399_v9  ;;  %v4003_v9 = vor.u32 %v4875_v7, %v4002_v6  ;;  %v4863_v6 = vld [vmem:[%s5557_s17 + $0x30c] sm:$0xf0] }
  0x7e   : > { %v3955_v15 = vor.u32 %v4863_v6, %v3954_v5  ;;  %v3684_v5 = vld [vmem:[%s5557_s17 + $0x110] sm:$0xf0] }
  0x7f   : > { %1578 = vmatpush.bf16.msrb.mxu0 %v4003_v9  ;;  %v4766_v9 = vld [vmem:[%s5557_s17 + $0xc] sm:$0xf] }
  0x83   : > { %1579 = vmatpush.bf16.msrb.mxu0 %v3987_v53  ;;  %v3708_v53 = vld [vmem:[%s5557_s17 + $0x138] sm:$0xf0] }
  0x85   : > { %3535 = vmatmul.msk.f32.gmra.mxu0 %vm415_vm0, %v400_v10  ;;  %v4771_v10 = vld [vmem:[%s5557_s17 + $0x2c] sm:$0xf0] }
  0x87   : > { %1580 = vmatpush.bf16.msrb.mxu0 %v3971_v2  ;;  %v4798_v2 = vld [vmem:[%s5557_s17 + $0x10c] sm:$0xf] }
  0x8b   : > { %1581 = vmatpush.bf16.msrb.mxu0 %v3955_v15  ;;  %v3798_v15 = vld [vmem:[%s5557_s17 + $0x1e0] sm:$0xf] }
  0x8d   : > { %3536 = vmatmul.msk.f32.gmra.mxu0 %vm415_vm0, %v401_v11  ;;  %v4769_v11 = vld [vmem:[%s5557_s17 + $0x24] sm:$0xf] }
  0x95   : > { %3537 = vmatmul.msk.f32.gmra.mxu0 %vm415_vm0, %v402_v12  ;;  %v3632_v12 = vld [vmem:[%s5557_s17 + $0x30] sm:$0xf0] }
  0x96   : > { %v3635_v14 = vor.u32 %v4769_v11, %v3632_v12  ;;  %v3682_v11 = vld [vmem:[%s5557_s17 + $0x100] sm:$0xf]  ;;  %v4799_v12 = vld [vmem:[%s5557_s17 + $0x10c] sm:$0xf0] }
  0x97   : > { %v3683_v22 = vor.u32 %v4799_v12, %v3682_v11  ;;  %v4825_v11 = vld [vmem:[%s5557_s17 + $0x1e4] sm:$0xf]  ;;  %v3800_v12 = vld [vmem:[%s5557_s17 + $0x1f0] sm:$0xf0] }
  0x98   : > { %817 = vmatpush.bf16.msrb.mxu3 %v3635_v14  ;;  %v4768_v14 = vld [vmem:[%s5557_s17 + $0x14] sm:$0xf0] }
  0x9c   : > { %818 = vmatpush.bf16.msrb.mxu3 %v3619_v25  ;;  %v4812_v25 = vld [vmem:[%s5557_s17 + $0x174] sm:$0xf0] }
  0x9d   : > { %3538 = vmatmul.msk.f32.gmra.mxu0 %vm415_vm0, %v403_v13  ;;  %v3631_v13 = vor.u32 %v4771_v10, %v3630_v8  ;;  %v3639_v8 = vor.u32 %v4772_v1, %v3638_v0  ;;  %v3624_v10 = vld [vmem:[%s5557_s17 + $0x18] sm:$0xf0]  ;;  %v3690_v0 = vld [vmem:[%s5557_s17 + $0x108] sm:$0xf]  ;;  %v4800_v1 = vld [vmem:[%s5557_s17 + $0x114] sm:$0xf0] }
  0x9e   : > { %v3627_v20 = vor.u32 %v4766_v9, %v3624_v10 }
  0x9f   : > { %804 = vmatpush.bf16.msrb.mxu2 %v3631_v13  ;;  %v3622_v13 = vld [vmem:[%s5557_s17 + $0x8] sm:$0xf] }
  0xa3   : > { %805 = vmatpush.bf16.msrb.mxu2 %v3615_v21  ;;  %v4071_v21 = vor.u32 %v4891_v17, %v4070_v16  ;;  %v4827_v16 = vld [vmem:[%s5557_s17 + $0x1ec] sm:$0xf0] }
  0xa5   : > { %3539 = vmatmul.msk.f32.gmra.mxu0 %vm415_vm0, %v404_v26  ;;  %v3559_v26 = vor.u32 %v4782_v23, %v3556_v24  ;;  %v3623_v23 = vor.u32 %v4768_v14, %v3622_v13  ;;  %v3738_v24 = vld [vmem:[%s5557_s17 + $0x168] sm:$0xf]  ;;  %v4828_v14 = vld [vmem:[%s5557_s17 + $0x1f4] sm:$0xf0] }
  0xa6   : > { %1734 = vmatpush.bf16.msra.mxu0 %v4071_v21  ;;  %v3739_v33 = vor.u32 %v4812_v25, %v3738_v24  ;;  %v3806_v13 = vld [vmem:[%s5557_s17 + $0x1e8] sm:$0xf]  ;;  %v3799_v21 = vor.u32 %v4827_v16, %v3798_v15  ;;  %v4824_v25 = vld [vmem:[%s5557_s17 + $0x1d4] sm:$0xf0]  ;;  %v3852_v15 = vld [vmem:[%s5557_s17 + $0x250] sm:$0xf0] }
  0xa7   : > { %709 = vmatpush.bf16.msrb.mxu1 %v3559_v26  ;;  %v4810_v26 = vld [vmem:[%s5557_s17 + $0x16c] sm:$0xf]  ;;  %v3790_v24 = vld [vmem:[%s5557_s17 + $0x1c8] sm:$0xf] }
  0xa8   : > { %v4822_v16 = vld [vmem:[%s5557_s17 + $0x1cc] sm:$0xf] }
  0xad   : > { %3540 = vmatmul.msk.f32.gmra.mxu0 %vm415_vm0, %v405_v63  ;;  %v4803_v63 = vld [vmem:[%s5557_s17 + $0x12c] sm:$0xf0] }
  0xae   : > { %v3699_v7 = vor.u32 %v4803_v63, %v3698_v62  ;;  %v3711_v62 = vor.u32 %v4802_v52, %v3708_v53  ;;  %v4122_v52 = vld [vmem:[%s5557_s17 + $0x440] sm:$0xf]  ;;  %v4903_v53 = vld [vmem:[%s5557_s17 + $0x44c] sm:$0xf0] }
  0xb5   : > { %3541 = vmatmul.msk.f32.gmra.mxu0 %vm415_vm0, %v406_v27  ;;  %v3740_v27 = vld [vmem:[%s5557_s17 + $0x178] sm:$0xf0] }
  0xb6   : > { %v3743_v35 = vor.u32 %v4810_v26, %v3740_v27  ;;  %v3782_v26 = vld [vmem:[%s5557_s17 + $0x1c0] sm:$0xf]  ;;  %v4823_v27 = vld [vmem:[%s5557_s17 + $0x1cc] sm:$0xf0] }
  0xbd   : > { %3542 = vmatmul.msk.f32.gmra.mxu0 %vm415_vm0, %v407_v29  ;;  %v3732_v29 = vld [vmem:[%s5557_s17 + $0x170] sm:$0xf0] }
  0xc5   : > { %3543 = vmatmul.msk.f32.gmra.mxu0 %vm415_vm0, %v408_v49 }
  0xca   : > { %v481_v28 = vpop.f32.mrf.mxu0 }
  0xcb   : > { %v482_v3 = vadd.f32 %v5659_v30, %v481_v28  ;;  %v4809_v28 = vld [vmem:[%s5557_s17 + $0x164] sm:$0xf] }
  0xcc   : > { %v3735_v36 = vor.u32 %v4809_v28, %v3732_v29 }
  0xcd   : > { %v529_v18 = vmax.f32 %v482_v3, 0.0  ;;  %v3692_v3 = vld [vmem:[%s5557_s17 + $0x118] sm:$0xf0] }
  0xce   : > { %v3695_v9 = vor.u32 %v4798_v2, %v3692_v3  ;;  %v3868_v2 = vld [vmem:[%s5557_s17 + $0x270] sm:$0xf0]  ;;  %v4826_v3 = vld [vmem:[%s5557_s17 + $0x1ec] sm:$0xf] }
  0xcf   : > { %v5717_v34 = vpack.c.bf16 %v529_v18, %v529_v18  ;;  %v3803_v18 = vor.u32 %v4825_v11, %v3800_v12  ;;  %v3850_v11 = vld [vmem:[%s5557_s17 + $0x240] sm:$0xf]  ;;  %v4839_v12 = vld [vmem:[%s5557_s17 + $0x24c] sm:$0xf0] }
  0xd2   : > { %v484_v31 = vpop.f32.mrf.mxu0 }
  0xd3   : > { %v485_v32 = vadd.f32 %v5659_v30, %v484_v31  ;;  %v4054_v31 = vld [vmem:[%s5557_s17 + $0x3c0] sm:$0xf] }
  0xd5   : > { %v530_v39 = vmax.f32 %v485_v32, 0.0  ;;  %v4887_v32 = vld [vmem:[%s5557_s17 + $0x3cc] sm:$0xf0] }
  0xd6   : > { %v4055_v43 = vor.u32 %v4887_v32, %v4054_v31  ;;  %v4817_v31 = vld [vmem:[%s5557_s17 + $0x1a4] sm:$0xf]  ;;  %v3768_v32 = vld [vmem:[%s5557_s17 + $0x1b0] sm:$0xf0] }
  0xd7   : > { %v5671_v44 = vpack.c.bf16 %v530_v39, %v530_v39  ;;  %v4806_v39 = vld [vmem:[%s5557_s17 + $0x14c] sm:$0xf] }
  0xd8   : > { %1735 = vmatpush.bf16.msra.mxu0 %v4055_v43  ;;  %v3771_v43 = vor.u32 %v4817_v31, %v3768_v32  ;;  %v4923_v31 = vld [vmem:[%s5557_s17 + $0x4ec] sm:$0xf0] }
  0xd9   : > { %3608 = vmatmul.msk.bf16.vlgmr.msra.gmra.mxu1 %vm659_vm1, %v5671_v44  ;;  %3609 = vmatmul.msk.bf16.vlgmr.msra.gmra.mxu2 %vm659_vm1, %v5671_v44 }
  0xda   : > { %3610 = vmatmul.msk.bf16.vlgmr.msra.gmra.mxu3 %vm659_vm1, %v5671_v44  ;;  %v5686_v54 = vpop.f32.mrf.mxu0  ;;  %841 = vmatpush.bf16.msra.mxu2 %v3675_v40  ;;  %v3724_v40 = vld [vmem:[%s5557_s17 + $0x158] sm:$0xf0] }
  0xdb   : > { %954 = vmatpush.bf16.msra.mxu3 %v3731_v45  ;;  %828 = vmatpush.bf16.msra.mxu1 %v3671_v46  ;;  %v3723_v46 = vor.u32 %v4808_v38, %v3722_v37  ;;  %v3727_v49 = vor.u32 %v4806_v39, %v3724_v40  ;;  %v488_v60 = vadd.f32 %v5659_v30, %v5686_v54  ;;  %v3774_v37 = vld [vmem:[%s5557_s17 + $0x1a8] sm:$0xf]  ;;  %v4907_v38 = vld [vmem:[%s5557_s17 + $0x46c] sm:$0xf0]  ;;  %v4820_v39 = vld [vmem:[%s5557_s17 + $0x1b4] sm:$0xf0] }
  0xdc   : > { %1736 = vmatpush.bf16.msra.mxu0 %v4039_v57  ;;  %v3766_v40 = vld [vmem:[%s5557_s17 + $0x1a0] sm:$0xf]  ;;  %v4815_v57 = vld [vmem:[%s5557_s17 + $0x18c] sm:$0xf0] }
  0xdd   : > { %v531_v6 = vmax.f32 %v488_v60, 0.0  ;;  %v4123_v60 = vor.u32 %v4903_v53, %v4122_v52 }
  0xde   : > { %842 = vmatpush.bf16.msra.mxu2 %v3659_v55  ;;  %v4801_v55 = vld [vmem:[%s5557_s17 + $0x124] sm:$0xf] }
  0xdf   : > { %955 = vmatpush.bf16.msra.mxu3 %v3715_v58  ;;  %829 = vmatpush.bf16.msra.mxu1 %v3655_v59  ;;  %v4022_v58 = vld [vmem:[%s5557_s17 + $0x380] sm:$0xf]  ;;  %v4879_v59 = vld [vmem:[%s5557_s17 + $0x38c] sm:$0xf0]  ;;  %v3703_v63 = vor.u32 %v4801_v55, %v3700_v56  ;;  %v5759_v17 = vpack.c.bf16 %v531_v6, %v531_v6  ;;  %v4816_v55 = vld [vmem:[%s5557_s17 + $0x194] sm:$0xf0] }
  0xe0   : > { %v4023_v54 = vor.u32 %v4879_v59, %v4022_v58  ;;  %v3750_v56 = vld [vmem:[%s5557_s17 + $0x180] sm:$0xf]  ;;  %v3755_v59 = vor.u32 %v4813_v47, %v3752_v48  ;;  %v4899_v6 = vld [vmem:[%s5557_s17 + $0x42c] sm:$0xf0]  ;;  %v4814_v48 = vld [vmem:[%s5557_s17 + $0x18c] sm:$0xf] }
  0xe1   : > { %v4919_v47 = vld [vmem:[%s5557_s17 + $0x4cc] sm:$0xf0] }
  0xe2   : > { %v5707_v19 = vpop.f32.mrf.mxu0  ;;  %843 = vmatpush.bf16.msra.mxu2 %v3643_v4  ;;  %v4797_v4 = vld [vmem:[%s5557_s17 + $0x104] sm:$0xf]  ;;  %1737 = vmatpush.bf16.msra.mxu0 %v4023_v54  ;;  %v4106_v54 = vld [vmem:[%s5557_s17 + $0x420] sm:$0xf] }
  0xe3   : > { %956 = vmatpush.bf16.msra.mxu3 %v3699_v7  ;;  %830 = vmatpush.bf16.msra.mxu1 %v3639_v8  ;;  %v3691_v8 = vor.u32 %v4800_v1, %v3690_v0  ;;  %v3687_v10 = vor.u32 %v4797_v4, %v3684_v5  ;;  %v4843_v0 = vld [vmem:[%s5557_s17 + $0x26c] sm:$0xf0]  ;;  %v4841_v1 = vld [vmem:[%s5557_s17 + $0x264] sm:$0xf]  ;;  %v3808_v4 = vld [vmem:[%s5557_s17 + $0x1f8] sm:$0xf0] }
  0xe6   : > { %844 = vmatpush.bf16.msra.mxu2 %v3627_v20  ;;  %v3807_v20 = vor.u32 %v4828_v14, %v3806_v13  ;;  %v4837_v13 = vld [vmem:[%s5557_s17 + $0x244] sm:$0xf]  ;;  %v4107_v14 = vor.u32 %v4899_v6, %v4106_v54  ;;  %v4838_v54 = vld [vmem:[%s5557_s17 + $0x24c] sm:$0xf]  ;;  %v3860_v6 = vld [vmem:[%s5557_s17 + $0x258] sm:$0xf0] }
  0xe7   : > { %957 = vmatpush.bf16.msra.mxu3 %v3683_v22  ;;  %831 = vmatpush.bf16.msra.mxu1 %v3623_v23  ;;  %v4821_v22 = vld [vmem:[%s5557_s17 + $0x1c4] sm:$0xf]  ;;  %v3784_v23 = vld [vmem:[%s5557_s17 + $0x1d0] sm:$0xf0] }
  0xe8   : > { %v3787_v29 = vor.u32 %v4821_v22, %v3784_v23  ;;  %v4895_v22 = vld [vmem:[%s5557_s17 + $0x40c] sm:$0xf0]  ;;  %v3851_v23 = vor.u32 %v4839_v12, %v3850_v11  ;;  %v3858_v11 = vld [vmem:[%s5557_s17 + $0x248] sm:$0xf]  ;;  %v4840_v12 = vld [vmem:[%s5557_s17 + $0x254] sm:$0xf0] }
  0xe9   : > { %3611 = vmatmul.msk.bf16.vlgmr.msrb.gmra.mxu1 %vm659_vm1, %v5671_v44  ;;  %3676 = vmatmul.msk.bf16.vlgmr.msrb.gmra.mxu2 %vm659_vm1, %v5717_v34  ;;  %v3719_v44 = vor.u32 %v4805_v41, %v3716_v42  ;;  %v4819_v41 = vld [vmem:[%s5557_s17 + $0x1ac] sm:$0xf0] }
  0xea   : > { %3677 = vmatmul.msk.bf16.vlgmr.msrb.gmra.mxu3 %vm659_vm1, %v5717_v34  ;;  %v5731_v45 = vpop.f32.mrf.mxu0  ;;  %980 = vmatpush.bf16.msrb.mxu2 %v3739_v33  ;;  %v3767_v50 = vor.u32 %v4819_v41, %v3766_v40  ;;  %v4831_v40 = vld [vmem:[%s5557_s17 + $0x20c] sm:$0xf0] }
  0xeb   : > { %993 = vmatpush.bf16.msrb.mxu3 %v3743_v35  ;;  %967 = vmatpush.bf16.msrb.mxu1 %v3735_v36  ;;  %v3791_v35 = vor.u32 %v4824_v25, %v3790_v24  ;;  %v3783_v36 = vor.u32 %v4823_v27, %v3782_v26  ;;  %v3834_v24 = vld [vmem:[%s5557_s17 + $0x220] sm:$0xf]  ;;  %v4835_v25 = vld [vmem:[%s5557_s17 + $0x22c] sm:$0xf0]  ;;  %v3855_v26 = vor.u32 %v4837_v13, %v3852_v15 }
  0xec   : > { %v4911_v15 = vld [vmem:[%s5557_s17 + $0x48c] sm:$0xf0] }
  0xee   : > { %981 = vmatpush.bf16.msrb.mxu2 %v3723_v46 }
  0xef   : > { %994 = vmatpush.bf16.msrb.mxu3 %v3727_v49  ;;  %968 = vmatpush.bf16.msrb.mxu1 %v3719_v44  ;;  %v3775_v44 = vor.u32 %v4820_v39, %v3774_v37  ;;  %v3818_v39 = vld [vmem:[%s5557_s17 + $0x200] sm:$0xf] }
  0xf0   : > { %v3819_v52 = vor.u32 %v4831_v40, %v3818_v39  ;;  %v3886_v39 = vld [vmem:[%s5557_s17 + $0x280] sm:$0xf] }
  0xf1   : > { %v4258_v40 = vld [vmem:[%s5557_s17 + $0x540] sm:$0xf] }
  0xf2   : > { %v5751_v7 = vpop.f32.mrf.mxu0  ;;  %982 = vmatpush.bf16.msrb.mxu2 %v3707_v61  ;;  %v3759_v61 = vor.u32 %v4816_v55, %v3758_v51 }
  0xf3   : > { %995 = vmatpush.bf16.msrb.mxu3 %v3711_v62  ;;  %969 = vmatpush.bf16.msrb.mxu1 %v3703_v63  ;;  %v3751_v62 = vor.u32 %v4815_v57, %v3750_v56  ;;  %v3866_v63 = vld [vmem:[%s5557_s17 + $0x260] sm:$0xf]  ;;  %v4842_v57 = vld [vmem:[%s5557_s17 + $0x26c] sm:$0xf] }
  0xf6   : > { %983 = vmatpush.bf16.msrb.mxu2 %v3691_v8  ;;  %v3867_v8 = vor.u32 %v4843_v0, %v3866_v63 }
  0xf7   : > { %996 = vmatpush.bf16.msrb.mxu3 %v3695_v9  ;;  %970 = vmatpush.bf16.msrb.mxu1 %v3687_v10  ;;  %v3871_v9 = vor.u32 %v4841_v1, %v3868_v2  ;;  %v3811_v10 = vor.u32 %v4826_v3, %v3808_v4  ;;  %v4174_v1 = vld [vmem:[%s5557_s17 + $0x4a0] sm:$0xf]  ;;  %v4915_v2 = vld [vmem:[%s5557_s17 + $0x4ac] sm:$0xf0] }
  0xf9   : > { %3678 = vmatmul.msk.bf16.vlgmr.msra.gmra.mxu1 %vm659_vm1, %v5717_v34  ;;  %3679 = vmatmul.msk.bf16.vlgmr.msra.gmra.mxu2 %vm659_vm1, %v5717_v34  ;;  %v4138_v34 = vld [vmem:[%s5557_s17 + $0x460] sm:$0xf] }
  0xfa   : > { %3744 = vmatmul.msk.bf16.vlgmr.msra.gmra.mxu3 %vm659_vm1, %v5759_v17  ;;  %v499_v28 = vpop.f32.mrf.mxu0  ;;  %1123 = vmatpush.bf16.msra.mxu2 %v3803_v18  ;;  %v4139_v46 = vor.u32 %v4907_v38, %v4138_v34  ;;  %v3792_v18 = vld [vmem:[%s5557_s17 + $0x1d8] sm:$0xf0]  ;;  %v3835_v34 = vor.u32 %v4835_v25, %v3834_v24  ;;  %v4274_v24 = vld [vmem:[%s5557_s17 + $0x560] sm:$0xf]  ;;  %v4939_v25 = vld [vmem:[%s5557_s17 + $0x56c] sm:$0xf0] }
  0xfb   : > { %v500_v33 = vadd.f32 %v5659_v30, %v499_v28  ;;  %1136 = vmatpush.bf16.msra.mxu3 %v3807_v20  ;;  %1110 = vmatpush.bf16.msra.mxu1 %v3799_v21  ;;  %v4090_v21 = vld [vmem:[%s5557_s17 + $0x400] sm:$0xf]  ;;  %v3795_v27 = vor.u32 %v4822_v16, %v3792_v18  ;;  %v4833_v28 = vld [vmem:[%s5557_s17 + $0x224] sm:$0xf]  ;;  %v3863_v16 = vor.u32 %v4838_v54, %v3860_v6  ;;  %v4834_v18 = vld [vmem:[%s5557_s17 + $0x22c] sm:$0xf] }
  0xfc   : > { %v4091_v32 = vor.u32 %v4895_v22, %v4090_v21  ;;  %v3859_v22 = vor.u32 %v4840_v12, %v3858_v11  ;;  %v3928_v54 = vld [vmem:[%s5557_s17 + $0x2d8] sm:$0xf0]  ;;  %v4853_v6 = vld [vmem:[%s5557_s17 + $0x2c4] sm:$0xf]  ;;  %v4927_v11 = vld [vmem:[%s5557_s17 + $0x50c] sm:$0xf0] }
  0xfd   : > { %v535_v42 = vmax.f32 %v500_v33, 0.0  ;;  %v3836_v33 = vld [vmem:[%s5557_s17 + $0x230] sm:$0xf0] }
  0xfe   : > { %1124 = vmatpush.bf16.msra.mxu2 %v3787_v29  ;;  %v4206_v29 = vld [vmem:[%s5557_s17 + $0x4e0] sm:$0xf]  ;;  %v3839_v41 = vor.u32 %v4833_v28, %v3836_v33  ;;  %v3842_v28 = vld [vmem:[%s5557_s17 + $0x228] sm:$0xf] }
  0xff   : > { %v5784_v49 = vpack.c.bf16 %v535_v42, %v535_v42  ;;  %1137 = vmatpush.bf16.msra.mxu3 %v3791_v35  ;;  %1111 = vmatpush.bf16.msra.mxu1 %v3783_v36  ;;  %v3776_v35 = vld [vmem:[%s5557_s17 + $0x1b8] sm:$0xf0]  ;;  %v491_v36 = vadd.f32 %v5659_v30, %v5707_v19  ;;  %v4207_v38 = vor.u32 %v4923_v31, %v4206_v29  ;;  %v3820_v19 = vld [vmem:[%s5557_s17 + $0x210] sm:$0xf0]  ;;  %v4836_v29 = vld [vmem:[%s5557_s17 + $0x234] sm:$0xf0] }
 0x100   : > { %v494_v31 = vadd.f32 %v5659_v30, %v5731_v45  ;;  %v4847_v45 = vld [vmem:[%s5557_s17 + $0x28c] sm:$0xf0] }
 0x101   : > { %4016 = vmatmul.msk.bf16.vlgmr.msrb.gmra.mxu0 %vm659_vm1, %v5784_v49 }
 0x102   : > { %v502_v58 = vpop.f32.mrf.mxu0  ;;  %1125 = vmatpush.bf16.msra.mxu2 %v3771_v43  ;;  %1890 = vmatpush.bf16.msrb.mxu0 %v4139_v46  ;;  %v4829_v43 = vld [vmem:[%s5557_s17 + $0x204] sm:$0xf]  ;;  %v4190_v46 = vld [vmem:[%s5557_s17 + $0x4c0] sm:$0xf] }
 0x103   : > { %1138 = vmatpush.bf16.msra.mxu3 %v3775_v44  ;;  %1112 = vmatpush.bf16.msra.mxu1 %v3767_v50  ;;  %v503_v5 = vadd.f32 %v5659_v30, %v502_v58  ;;  %v3760_v44 = vld [vmem:[%s5557_s17 + $0x198] sm:$0xf0]  ;;  %v532_v50 = vmax.f32 %v491_v36, 0.0  ;;  %v4191_v53 = vor.u32 %v4919_v47, %v4190_v46  ;;  %v3823_v55 = vor.u32 %v4829_v43, %v3820_v19  ;;  %v4832_v43 = vld [vmem:[%s5557_s17 + $0x214] sm:$0xf0] }
 0x104   : > { %v3763_v56 = vor.u32 %v4814_v48, %v3760_v44  ;;  %v3876_v58 = vld [vmem:[%s5557_s17 + $0x278] sm:$0xf0]  ;;  %v533_v46 = vmax.f32 %v494_v31, 0.0  ;;  %v3887_v44 = vor.u32 %v4847_v45, %v3886_v39  ;;  %v4848_v31 = vld [vmem:[%s5557_s17 + $0x294] sm:$0xf0] }
 0x105   : > { %v536_v20 = vmax.f32 %v503_v5, 0.0  ;;  %v5845_v63 = vpack.c.bf16 %v532_v50, %v532_v50  ;;  %v3879_v3 = vor.u32 %v4842_v57, %v3876_v58  ;;  %v3828_v36 = vld [vmem:[%s5557_s17 + $0x218] sm:$0xf0]  ;;  %v3936_v57 = vld [vmem:[%s5557_s17 + $0x2f0] sm:$0xf0] }
 0x106   : > { %1126 = vmatpush.bf16.msra.mxu2 %v3755_v59  ;;  %1891 = vmatpush.bf16.msrb.mxu0 %v4123_v60  ;;  %v3934_v59 = vld [vmem:[%s5557_s17 + $0x2e0] sm:$0xf]  ;;  %v4859_v60 = vld [vmem:[%s5557_s17 + $0x2ec] sm:$0xf0]  ;;  %v5892_v58 = vpack.c.bf16 %v533_v46, %v533_v46  ;;  %v4845_v39 = vld [vmem:[%s5557_s17 + $0x284] sm:$0xf] }
 0x107   : > { %1139 = vmatpush.bf16.msra.mxu3 %v3759_v61  ;;  %1113 = vmatpush.bf16.msra.mxu1 %v3751_v62  ;;  %v5827_v37 = vpack.c.bf16 %v536_v20, %v536_v20  ;;  %v3874_v61 = vld [vmem:[%s5557_s17 + $0x268] sm:$0xf]  ;;  %v4844_v62 = vld [vmem:[%s5557_s17 + $0x274] sm:$0xf0]  ;;  %v3935_v4 = vor.u32 %v4859_v60, %v3934_v59  ;;  %v3844_v20 = vld [vmem:[%s5557_s17 + $0x238] sm:$0xf0] }
 0x108   : > { %v3875_v5 = vor.u32 %v4844_v62, %v3874_v61  ;;  %v3847_v33 = vor.u32 %v4834_v18, %v3844_v20  ;;  %v4242_v60 = vld [vmem:[%s5557_s17 + $0x520] sm:$0xf]  ;;  %v4931_v61 = vld [vmem:[%s5557_s17 + $0x52c] sm:$0xf0] }
 0x109   : > { %3745 = vmatmul.msk.bf16.vlgmr.msrb.gmra.mxu1 %vm659_vm1, %v5759_v17  ;;  %3746 = vmatmul.msk.bf16.vlgmr.msrb.gmra.mxu2 %vm659_vm1, %v5759_v17  ;;  %v4342_v18 = vld [vmem:[%s5557_s17 + $0x5e0] sm:$0xf]  ;;  %v4955_v20 = vld [vmem:[%s5557_s17 + $0x5ec] sm:$0xf0] }
 0x10a   : > { %3747 = vmatmul.msk.bf16.vlgmr.msrb.gmra.mxu3 %vm659_vm1, %v5759_v17  ;;  %1266 = vmatpush.bf16.msrb.mxu2 %v3867_v8  ;;  %v4818_v17 = vld [vmem:[%s5557_s17 + $0x1ac] sm:$0xf]  ;;  %v505_v51 = vpop.f32.mrf.mxu0  ;;  %v3918_v8 = vld [vmem:[%s5557_s17 + $0x2c0] sm:$0xf] }
 0x10b   : > { %1279 = vmatpush.bf16.msrb.mxu3 %v3871_v9  ;;  %1149 = vmatpush.bf16.msrb.mxu1 %v3811_v10  ;;  %v3779_v42 = vor.u32 %v4818_v17, %v3776_v35  ;;  %v506_v0 = vadd.f32 %v5659_v30, %v505_v51  ;;  %v4175_v9 = vor.u32 %v4915_v2, %v4174_v1  ;;  %v4855_v10 = vld [vmem:[%s5557_s17 + $0x2cc] sm:$0xf0]  ;;  %v4830_v35 = vld [vmem:[%s5557_s17 + $0x20c] sm:$0xf]  ;;  %v3942_v51 = vld [vmem:[%s5557_s17 + $0x2e8] sm:$0xf] }
 0x10c   : > { %1892 = vmatpush.bf16.msrb.mxu0 %v4107_v14  ;;  %v4158_v14 = vld [vmem:[%s5557_s17 + $0x480] sm:$0xf]  ;;  %v3919_v21 = vor.u32 %v4855_v10, %v3918_v8  ;;  %v4275_v17 = vor.u32 %v4939_v25, %v4274_v24  ;;  %v3831_v19 = vor.u32 %v4830_v35, %v3828_v36  ;;  %v3926_v2 = vld [vmem:[%s5557_s17 + $0x2c8] sm:$0xf]  ;;  %v3920_v8 = vld [vmem:[%s5557_s17 + $0x2d0] sm:$0xf0] }
 0x10d   : > { %v537_v13 = vmax.f32 %v506_v0, 0.0  ;;  %v4226_v10 = vld [vmem:[%s5557_s17 + $0x500] sm:$0xf]  ;;  %v3904_v24 = vld [vmem:[%s5557_s17 + $0x2b0] sm:$0xf0] }
 0x10e   : > { %1267 = vmatpush.bf16.msrb.mxu2 %v3851_v23  ;;  %v3902_v23 = vld [vmem:[%s5557_s17 + $0x2a0] sm:$0xf]  ;;  %v4846_v35 = vld [vmem:[%s5557_s17 + $0x28c] sm:$0xf] }
 0x10f   : > { %1280 = vmatpush.bf16.msrb.mxu3 %v3855_v26  ;;  %1150 = vmatpush.bf16.msrb.mxu1 %v3795_v27  ;;  %v4159_v26 = vor.u32 %v4911_v15, %v4158_v14  ;;  %v4851_v27 = vld [vmem:[%s5557_s17 + $0x2ac] sm:$0xf0]  ;;  %v4852_v14 = vld [vmem:[%s5557_s17 + $0x2b4] sm:$0xf0]  ;;  %v3923_v15 = vor.u32 %v4853_v6, %v3920_v8  ;;  %v4326_v36 = vld [vmem:[%s5557_s17 + $0x5c0] sm:$0xf] }
 0x110   : > { %1893 = vmatpush.bf16.msrb.mxu0 %v4091_v32  ;;  %v5874_v32 = vpack.c.bf16 %v537_v13, %v537_v13  ;;  %v3910_v13 = vld [vmem:[%s5557_s17 + $0x2a8] sm:$0xf] }
 0x111   : > { %4084 = vmatmul.msk.bf16.vlgmr.msra.gmra.mxu0 %vm659_vm1, %v5827_v37  ;;  %v3978_v8 = vld [vmem:[%s5557_s17 + $0x328] sm:$0xf] }
 0x112   : > { %1268 = vmatpush.bf16.msrb.mxu2 %v3835_v34  ;;  %v3903_v34 = vor.u32 %v4851_v27, %v3902_v23  ;;  %v508_v47 = vpop.f32.mrf.mxu0  ;;  %v4849_v23 = vld [vmem:[%s5557_s17 + $0x2a4] sm:$0xf]  ;;  %v3911_v27 = vor.u32 %v4852_v14, %v3910_v13  ;;  %v4971_v13 = vld [vmem:[%s5557_s17 + $0x66c] sm:$0xf0] }
 0x113   : > { %1281 = vmatpush.bf16.msrb.mxu3 %v3839_v41  ;;  %1151 = vmatpush.bf16.msrb.mxu1 %v3779_v42  ;;  %v4935_v41 = vld [vmem:[%s5557_s17 + $0x54c] sm:$0xf0]  ;;  %v3826_v42 = vld [vmem:[%s5557_s17 + $0x208] sm:$0xf]  ;;  %v509_v59 = vadd.f32 %v5659_v30, %v508_v47 }
 0x114   : > { %2046 = vmatpush.bf16.msra.mxu0 %v4207_v38  ;;  %v3843_v38 = vor.u32 %v4836_v29, %v3842_v28  ;;  %v4259_v48 = vor.u32 %v4935_v41, %v4258_v40  ;;  %v3827_v50 = vor.u32 %v4832_v43, %v3826_v42  ;;  %v4343_v28 = vor.u32 %v4955_v20, %v4342_v18  ;;  %v3894_v29 = vld [vmem:[%s5557_s17 + $0x288] sm:$0xf] }
 0x115   : > { %v3895_v45 = vor.u32 %v4848_v31, %v3894_v29  ;;  %v4010_v47 = vld [vmem:[%s5557_s17 + $0x368] sm:$0xf]  ;;  %v4967_v29 = vld [vmem:[%s5557_s17 + $0x64c] sm:$0xf0]  ;;  %v3964_v31 = vld [vmem:[%s5557_s17 + $0x318] sm:$0xf0] }
 0x116   : > { %1269 = vmatpush.bf16.msrb.mxu2 %v3819_v52  ;;  %v4860_v52 = vld [vmem:[%s5557_s17 + $0x2f4] sm:$0xf0] }
 0x117   : > { %1282 = vmatpush.bf16.msrb.mxu3 %v3823_v55  ;;  %1152 = vmatpush.bf16.msrb.mxu1 %v3763_v56  ;;  %v3944_v55 = vld [vmem:[%s5557_s17 + $0x2f8] sm:$0xf0]  ;;  %v4857_v56 = vld [vmem:[%s5557_s17 + $0x2e4] sm:$0xf]  ;;  %v3943_v62 = vor.u32 %v4860_v52, %v3942_v51  ;;  %v4004_v51 = vld [vmem:[%s5557_s17 + $0x370] sm:$0xf0] }
 0x118   : > { %2047 = vmatpush.bf16.msra.mxu0 %v4191_v53  ;;  %v4858_v53 = vld [vmem:[%s5557_s17 + $0x2ec] sm:$0xf]  ;;  %v3939_v1 = vor.u32 %v4857_v56, %v3936_v57 }
 0x119   : > { %3812 = vmatmul.msk.bf16.vlgmr.msra.gmra.mxu1 %vm659_vm1, %v5845_v63  ;;  %3813 = vmatmul.msk.bf16.vlgmr.msra.gmra.mxu2 %vm659_vm1, %v5845_v63  ;;  %v3947_v0 = vor.u32 %v4858_v53, %v3944_v55  ;;  %v4310_v53 = vld [vmem:[%s5557_s17 + $0x5a0] sm:$0xf]  ;;  %v4947_v55 = vld [vmem:[%s5557_s17 + $0x5ac] sm:$0xf0] }
 0x11a   : > { %3814 = vmatmul.msk.bf16.vlgmr.msra.gmra.mxu3 %vm659_vm1, %v5845_v63  ;;  %1305 = vmatpush.bf16.msra.mxu2 %v3879_v3  ;;  %v4856_v3 = vld [vmem:[%s5557_s17 + $0x2d4] sm:$0xf0]  ;;  %v511_v41 = vpop.f32.mrf.mxu0 }
 0x11b   : > { %1422 = vmatpush.bf16.msra.mxu3 %v3935_v4  ;;  %1292 = vmatpush.bf16.msra.mxu1 %v3875_v5  ;;  %v4854_v4 = vld [vmem:[%s5557_s17 + $0x2cc] sm:$0xf]  ;;  %v4243_v5 = vor.u32 %v4931_v61, %v4242_v60  ;;  %v3927_v12 = vor.u32 %v4856_v3, %v3926_v2  ;;  %v512_v52 = vadd.f32 %v5659_v30, %v511_v41  ;;  %v3994_v61 = vld [vmem:[%s5557_s17 + $0x348] sm:$0xf]  ;;  %v4869_v2 = vld [vmem:[%s5557_s17 + $0x344] sm:$0xf] }
 0x11c   : > { %2048 = vmatpush.bf16.msra.mxu0 %v4175_v9  ;;  %v538_v9 = vmax.f32 %v509_v59, 0.0  ;;  %v3988_v3 = vld [vmem:[%s5557_s17 + $0x350] sm:$0xf0]  ;;  %v4890_v41 = vld [vmem:[%s5557_s17 + $0x3ec] sm:$0xf] }
 0x11e   : > { %1306 = vmatpush.bf16.msra.mxu2 %v3863_v16  ;;  %v4850_v16 = vld [vmem:[%s5557_s17 + $0x2ac] sm:$0xf]  ;;  %v5919_v25 = vpack.c.bf16 %v538_v9, %v538_v9  ;;  %v4868_v9 = vld [vmem:[%s5557_s17 + $0x334] sm:$0xf0] }
 0x11f   : > { %1423 = vmatpush.bf16.msra.mxu3 %v3919_v21  ;;  %1293 = vmatpush.bf16.msra.mxu1 %v3859_v22  ;;  %v4227_v21 = vor.u32 %v4927_v11, %v4226_v10  ;;  %v3912_v22 = vld [vmem:[%s5557_s17 + $0x2b8] sm:$0xf0]  ;;  %v3991_v11 = vor.u32 %v4869_v2, %v3988_v3  ;;  %v3979_v20 = vor.u32 %v4868_v9, %v3978_v8  ;;  %v4046_v2 = vld [vmem:[%s5557_s17 + $0x3a8] sm:$0xf]  ;;  %v4884_v3 = vld [vmem:[%s5557_s17 + $0x3b4] sm:$0xf0] }
 0x120   : > { %2049 = vmatpush.bf16.msra.mxu0 %v4159_v26  ;;  %v497_v26 = vadd.f32 %v5659_v30, %v5751_v7  ;;  %v3888_v7 = vld [vmem:[%s5557_s17 + $0x290] sm:$0xf0]  ;;  %v4870_v30 = vld [vmem:[%s5557_s17 + $0x34c] sm:$0xf]  ;;  %v4987_v8 = vld [vmem:[%s5557_s17 + $0x6ec] sm:$0xf0] }
 0x121   : > { %4152 = vmatmul.msk.bf16.vlgmr.msrb.gmra.mxu0 %vm659_vm1, %v5874_v32  ;;  %v3891_v46 = vor.u32 %v4845_v39, %v3888_v7  ;;  %v4078_v7 = vld [vmem:[%s5557_s17 + $0x3e8] sm:$0xf] }
 0x122   : > { %1307 = vmatpush.bf16.msra.mxu2 %v3847_v33  ;;  %v3915_v33 = vor.u32 %v4850_v16, %v3912_v22  ;;  %v534_v40 = vmax.f32 %v497_v26, 0.0  ;;  %v3972_v16 = vld [vmem:[%s5557_s17 + $0x330] sm:$0xf0]  ;;  %v3962_v22 = vld [vmem:[%s5557_s17 + $0x308] sm:$0xf] }
 0x123   : > { %1424 = vmatpush.bf16.msra.mxu3 %v3903_v34  ;;  %1294 = vmatpush.bf16.msra.mxu1 %v3843_v38  ;;  %v4951_v34 = vld [vmem:[%s5557_s17 + $0x5cc] sm:$0xf0]  ;;  %v3896_v38 = vld [vmem:[%s5557_s17 + $0x298] sm:$0xf0] }
 0x124   : > { %2202 = vmatpush.bf16.msrb.mxu0 %v4275_v17  ;;  %v3907_v17 = vor.u32 %v4849_v23, %v3904_v24  ;;  %v4327_v42 = vor.u32 %v4951_v34, %v4326_v36  ;;  %v3899_v43 = vor.u32 %v4846_v35, %v3896_v38  ;;  %v5942_v56 = vpack.c.bf16 %v534_v40, %v534_v40  ;;  %v4864_v23 = vld [vmem:[%s5557_s17 + $0x314] sm:$0xf0]  ;;  %v514_v35 = vpop.f32.mrf.mxu0 }
 0x125   : > { %v3963_v36 = vor.u32 %v4864_v23, %v3962_v22  ;;  %v4892_v40 = vld [vmem:[%s5557_s17 + $0x3f4] sm:$0xf0]  ;;  %v4983_v22 = vld [vmem:[%s5557_s17 + $0x6cc] sm:$0xf0]  ;;  %v4032_v23 = vld [vmem:[%s5557_s17 + $0x398] sm:$0xf0] }
 0x126   : > { %1308 = vmatpush.bf16.msra.mxu2 %v3831_v19  ;;  %v4876_v19 = vld [vmem:[%s5557_s17 + $0x374] sm:$0xf0] }
 0x127   : > { %1425 = vmatpush.bf16.msra.mxu3 %v3887_v44  ;;  %1295 = vmatpush.bf16.msra.mxu1 %v3827_v50  ;;  %v4012_v44 = vld [vmem:[%s5557_s17 + $0x378] sm:$0xf0]  ;;  %v4873_v50 = vld [vmem:[%s5557_s17 + $0x364] sm:$0xf]  ;;  %v4011_v57 = vor.u32 %v4876_v19, %v4010_v47  ;;  %v4378_v19 = vld [vmem:[%s5557_s17 + $0x620] sm:$0xf] }
 0x128   : > { %2203 = vmatpush.bf16.msrb.mxu0 %v4259_v48  ;;  %v4874_v48 = vld [vmem:[%s5557_s17 + $0x36c] sm:$0xf]  ;;  %v4007_v60 = vor.u32 %v4873_v50, %v4004_v51 }
 0x129   : > { %3815 = vmatmul.msk.bf16.vlgmr.msrb.gmra.mxu1 %vm659_vm1, %v5845_v63  ;;  %3880 = vmatmul.msk.bf16.vlgmr.msrb.gmra.mxu2 %vm659_vm1, %v5892_v58  ;;  %v3931_v63 = vor.u32 %v4854_v4, %v3928_v54  ;;  %v4015_v59 = vor.u32 %v4874_v48, %v4012_v44  ;;  %v539_v4 = vmax.f32 %v512_v52, 0.0  ;;  %v4943_v54 = vld [vmem:[%s5557_s17 + $0x58c] sm:$0xf0]  ;;  %v4079_v44 = vor.u32 %v4892_v40, %v4078_v7  ;;  %v4062_v52 = vld [vmem:[%s5557_s17 + $0x3c8] sm:$0xf] }
 0x12a   : > { %3881 = vmatmul.msk.bf16.vlgmr.msrb.gmra.mxu3 %vm659_vm1, %v5892_v58  ;;  %1448 = vmatpush.bf16.msrb.mxu2 %v3943_v62  ;;  %v4872_v62 = vld [vmem:[%s5557_s17 + $0x354] sm:$0xf0]  ;;  %v4963_v48 = vld [vmem:[%s5557_s17 + $0x62c] sm:$0xf0]  ;;  %v4446_v40 = vld [vmem:[%s5557_s17 + $0x6a0] sm:$0xf] }
 0x12b   : > { %1461 = vmatpush.bf16.msrb.mxu3 %v3947_v0  ;;  %1435 = vmatpush.bf16.msrb.mxu1 %v3939_v1  ;;  %v4311_v0 = vor.u32 %v4947_v55, %v4310_v53  ;;  %v3996_v1 = vld [vmem:[%s5557_s17 + $0x358] sm:$0xf0]  ;;  %v3995_v6 = vor.u32 %v4872_v62, %v3994_v61  ;;  %v5966_v18 = vpack.c.bf16 %v539_v4, %v539_v4  ;;  %v4888_v53 = vld [vmem:[%s5557_s17 + $0x3d4] sm:$0xf0]  ;;  %v4886_v55 = vld [vmem:[%s5557_s17 + $0x3cc] sm:$0xf] }
 0x12c   : > { %2204 = vmatpush.bf16.msrb.mxu0 %v4243_v5  ;;  %v4294_v5 = vld [vmem:[%s5557_s17 + $0x580] sm:$0xf]  ;;  %v3999_v10 = vor.u32 %v4870_v30, %v3996_v1  ;;  %v4056_v61 = vld [vmem:[%s5557_s17 + $0x3d0] sm:$0xf0]  ;;  %v4063_v1 = vor.u32 %v4888_v53, %v4062_v52  ;;  %v4901_v52 = vld [vmem:[%s5557_s17 + $0x444] sm:$0xf] }
 0x12d   : > { %v4295_v14 = vor.u32 %v4943_v54, %v4294_v5  ;;  %v4362_v30 = vld [vmem:[%s5557_s17 + $0x600] sm:$0xf]  ;;  %v4882_v54 = vld [vmem:[%s5557_s17 + $0x3ac] sm:$0xf]  ;;  %v4124_v53 = vld [vmem:[%s5557_s17 + $0x450] sm:$0xf0] }
 0x12e   : > { %1449 = vmatpush.bf16.msrb.mxu2 %v3927_v12  ;;  %v4410_v12 = vld [vmem:[%s5557_s17 + $0x660] sm:$0xf] }
 0x12f   : > { %1462 = vmatpush.bf16.msrb.mxu3 %v3931_v63  ;;  %1436 = vmatpush.bf16.msrb.mxu1 %v3923_v15  ;;  %v3980_v63 = vld [vmem:[%s5557_s17 + $0x338] sm:$0xf0]  ;;  %v4865_v15 = vld [vmem:[%s5557_s17 + $0x324] sm:$0xf] }
 0x130   : > { %2205 = vmatpush.bf16.msrb.mxu0 %v4227_v21  ;;  %v4411_v21 = vor.u32 %v4971_v13, %v4410_v12  ;;  %v3975_v26 = vor.u32 %v4865_v15, %v3972_v16  ;;  %v4047_v12 = vor.u32 %v4884_v3, %v4046_v2  ;;  %v4546_v2 = vld [vmem:[%s5557_s17 + $0x760] sm:$0xf]  ;;  %v5003_v3 = vld [vmem:[%s5557_s17 + $0x76c] sm:$0xf0] }
 0x131   : > { %4220 = vmatmul.msk.bf16.vlgmr.msra.gmra.mxu0 %vm659_vm1, %v5919_v25 }
 0x132   : > { %1450 = vmatpush.bf16.msrb.mxu2 %v3911_v27  ;;  %v4862_v27 = vld [vmem:[%s5557_s17 + $0x30c] sm:$0xf] }
 0x133   : > { %1463 = vmatpush.bf16.msrb.mxu3 %v3915_v33  ;;  %1437 = vmatpush.bf16.msrb.mxu1 %v3907_v17  ;;  %v4861_v33 = vld [vmem:[%s5557_s17 + $0x304] sm:$0xf]  ;;  %v3956_v17 = vld [vmem:[%s5557_s17 + $0x310] sm:$0xf0]  ;;  %v3967_v38 = vor.u32 %v4862_v27, %v3964_v31  ;;  %v517_v27 = vpop.f32.mrf.mxu0 }
 0x134   : > { %2358 = vmatpush.bf16.msra.mxu0 %v4343_v28  ;;  %v4394_v28 = vld [vmem:[%s5557_s17 + $0x640] sm:$0xf]  ;;  %v3959_v39 = vor.u32 %v4861_v33, %v3956_v17  ;;  %v4146_v17 = vld [vmem:[%s5557_s17 + $0x468] sm:$0xf] }
 0x135   : > { %v4395_v34 = vor.u32 %v4967_v29, %v4394_v28 }
 0x136   : > { %1451 = vmatpush.bf16.msrb.mxu2 %v3895_v45  ;;  %v4080_v45 = vld [vmem:[%s5557_s17 + $0x3f8] sm:$0xf0] }
 0x137   : > { %1464 = vmatpush.bf16.msrb.mxu3 %v3899_v43  ;;  %1438 = vmatpush.bf16.msrb.mxu1 %v3891_v46  ;;  %v4072_v43 = vld [vmem:[%s5557_s17 + $0x3f0] sm:$0xf0]  ;;  %v5984_v46 = vld [vmem:[#allocation5] ss:$0 sm:$0xff]  ;;  %v4083_v50 = vor.u32 %v4890_v41, %v4080_v45  ;;  %v4979_v41 = vld [vmem:[%s5557_s17 + $0x6ac] sm:$0xf0] }
 0x138   : > { %2359 = vmatpush.bf16.msra.mxu0 %v4327_v42  ;;  %v4889_v42 = vld [vmem:[%s5557_s17 + $0x3e4] sm:$0xf]  ;;  %v515_v47 = vadd.f32 %v5984_v46, %v514_v35  ;;  %v4908_v35 = vld [vmem:[%s5557_s17 + $0x474] sm:$0xf0]  ;;  %v518_v7 = vadd.f32 %v5984_v46, %v517_v27 }
 0x139   : > { %3882 = vmatmul.msk.bf16.vlgmr.msra.gmra.mxu1 %vm659_vm1, %v5892_v58  ;;  %3883 = vmatmul.msk.bf16.vlgmr.msra.gmra.mxu2 %vm659_vm1, %v5892_v58  ;;  %v4866_v58 = vld [vmem:[%s5557_s17 + $0x32c] sm:$0xf]  ;;  %v4075_v51 = vor.u32 %v4889_v42, %v4072_v43  ;;  %v4147_v42 = vor.u32 %v4908_v35, %v4146_v17 }
 0x13a   : > { %3948 = vmatmul.msk.bf16.vlgmr.msra.gmra.mxu3 %vm659_vm1, %v5942_v56  ;;  %1604 = vmatpush.bf16.msra.mxu2 %v4011_v57  ;;  %v3983_v24 = vor.u32 %v4866_v58, %v3980_v63  ;;  %v4379_v57 = vor.u32 %v4963_v48, %v4378_v19  ;;  %v540_v62 = vmax.f32 %v515_v47, 0.0  ;;  %v4880_v63 = vld [vmem:[%s5557_s17 + $0x394] sm:$0xf0]  ;;  %v4130_v19 = vld [vmem:[%s5557_s17 + $0x448] sm:$0xf] }
 0x13b   : > { %1617 = vmatpush.bf16.msra.mxu3 %v4015_v59  ;;  %1591 = vmatpush.bf16.msra.mxu1 %v4007_v60  ;;  %v4064_v59 = vld [vmem:[%s5557_s17 + $0x3d8] sm:$0xf0]  ;;  %v4885_v60 = vld [vmem:[%s5557_s17 + $0x3c4] sm:$0xf]  ;;  %v4904_v48 = vld [vmem:[%s5557_s17 + $0x454] sm:$0xf0] }
 0x13c   : > { %2360 = vmatpush.bf16.msra.mxu0 %v4311_v0  ;;  %v4959_v0 = vld [vmem:[%s5557_s17 + $0x60c] sm:$0xf0]  ;;  %v4067_v4 = vor.u32 %v4886_v55, %v4064_v59  ;;  %v4059_v5 = vor.u32 %v4885_v60, %v4056_v61  ;;  %v6011_v58 = vpack.c.bf16 %v540_v62, %v540_v62  ;;  %v541_v55 = vmax.f32 %v518_v7, 0.0  ;;  %v4114_v61 = vld [vmem:[%s5557_s17 + $0x428] sm:$0xf] }
 0x13d   : > { %v4363_v9 = vor.u32 %v4959_v0, %v4362_v30  ;;  %v4975_v59 = vld [vmem:[%s5557_s17 + $0x68c] sm:$0xf0]  ;;  %v4131_v60 = vor.u32 %v4904_v48, %v4130_v19  ;;  %v4900_v62 = vld [vmem:[%s5557_s17 + $0x434] sm:$0xf0]  ;;  %v4127_v0 = vor.u32 %v4901_v52, %v4124_v53  ;;  %v4922_v17 = vld [vmem:[%s5557_s17 + $0x4ec] sm:$0xf] }
 0x13e   : > { %1605 = vmatpush.bf16.msra.mxu2 %v3995_v6  ;;  %v4478_v6 = vld [vmem:[%s5557_s17 + $0x6e0] sm:$0xf]  ;;  %v4198_v48 = vld [vmem:[%s5557_s17 + $0x4c8] sm:$0xf]  ;;  %v4200_v52 = vld [vmem:[%s5557_s17 + $0x4d8] sm:$0xf0] }
 0x13f   : > { %1618 = vmatpush.bf16.msra.mxu3 %v3999_v10  ;;  %1592 = vmatpush.bf16.msra.mxu1 %v3991_v11  ;;  %v4881_v10 = vld [vmem:[%s5557_s17 + $0x3a4] sm:$0xf]  ;;  %v4040_v11 = vld [vmem:[%s5557_s17 + $0x3b0] sm:$0xf0]  ;;  %v4479_v13 = vor.u32 %v4987_v8, %v4478_v6  ;;  %v6058_v8 = vpack.c.bf16 %v541_v55, %v541_v55 }
 0x140   : > { %2361 = vmatpush.bf16.msra.mxu0 %v4295_v14  ;;  %v4030_v14 = vld [vmem:[%s5557_s17 + $0x388] sm:$0xf]  ;;  %v4043_v16 = vor.u32 %v4881_v10, %v4040_v11  ;;  %v4108_v6 = vld [vmem:[%s5557_s17 + $0x430] sm:$0xf0]  ;;  %v4115_v10 = vor.u32 %v4900_v62, %v4114_v61  ;;  %v4547_v11 = vor.u32 %v5003_v3, %v4546_v2  ;;  %v4917_v53 = vld [vmem:[%s5557_s17 + $0x4c4] sm:$0xf] }
 0x141   : > { %4288 = vmatmul.msk.bf16.vlgmr.msrb.gmra.mxu0 %vm659_vm1, %v5966_v18  ;;  %v4031_v28 = vor.u32 %v4880_v63, %v4030_v14  ;;  %v4192_v55 = vld [vmem:[%s5557_s17 + $0x4d0] sm:$0xf0]  ;;  %v4914_v3 = vld [vmem:[%s5557_s17 + $0x4ac] sm:$0xf] }
 0x142   : > { %1606 = vmatpush.bf16.msra.mxu2 %v3979_v20  ;;  %v4878_v20 = vld [vmem:[%s5557_s17 + $0x38c] sm:$0xf]  ;;  %v4195_v2 = vor.u32 %v4917_v53, %v4192_v55  ;;  %v4266_v55 = vld [vmem:[%s5557_s17 + $0x548] sm:$0xf] }
 0x143   : > { %1619 = vmatpush.bf16.msra.mxu3 %v3983_v24  ;;  %1593 = vmatpush.bf16.msra.mxu1 %v3975_v26  ;;  %v4877_v24 = vld [vmem:[%s5557_s17 + $0x384] sm:$0xf]  ;;  %v4024_v26 = vld [vmem:[%s5557_s17 + $0x390] sm:$0xf0]  ;;  %v4035_v31 = vor.u32 %v4878_v20, %v4032_v23  ;;  %v4999_v20 = vld [vmem:[%s5557_s17 + $0x74c] sm:$0xf0] }
 0x144   : > { %2514 = vmatpush.bf16.msrb.mxu0 %v4411_v21  ;;  %v4462_v21 = vld [vmem:[%s5557_s17 + $0x6c0] sm:$0xf]  ;;  %v4027_v33 = vor.u32 %v4877_v24, %v4024_v26  ;;  %v4893_v23 = vld [vmem:[%s5557_s17 + $0x404] sm:$0xf]  ;;  %v4092_v24 = vld [vmem:[%s5557_s17 + $0x410] sm:$0xf0] }
 0x145   : > { %v4463_v29 = vor.u32 %v4983_v22, %v4462_v21  ;;  %v520_v21 = vpop.f32.mrf.mxu0  ;;  %v4100_v22 = vld [vmem:[%s5557_s17 + $0x418] sm:$0xf0] }
 0x146   : > { %1607 = vmatpush.bf16.msra.mxu2 %v3963_v36  ;;  %v4906_v36 = vld [vmem:[%s5557_s17 + $0x46c] sm:$0xf]  ;;  %v521_v7 = vadd.f32 %v5984_v46, %v520_v21  ;;  %v4912_v21 = vld [vmem:[%s5557_s17 + $0x494] sm:$0xf0] }
 0x147   : > { %1620 = vmatpush.bf16.msra.mxu3 %v3967_v38  ;;  %1594 = vmatpush.bf16.msra.mxu1 %v3959_v39  ;;  %v4905_v38 = vld [vmem:[%s5557_s17 + $0x464] sm:$0xf]  ;;  %v4140_v39 = vld [vmem:[%s5557_s17 + $0x470] sm:$0xf0] }
 0x148   : > { %2515 = vmatpush.bf16.msrb.mxu0 %v4395_v34  ;;  %v4148_v34 = vld [vmem:[%s5557_s17 + $0x478] sm:$0xf0]  ;;  %v4143_v47 = vor.u32 %v4905_v38, %v4140_v39  ;;  %v4208_v38 = vld [vmem:[%s5557_s17 + $0x4f0] sm:$0xf0] }
 0x149   : > { %3949 = vmatmul.msk.bf16.vlgmr.msrb.gmra.mxu1 %vm659_vm1, %v5942_v56  ;;  %3950 = vmatmul.msk.bf16.vlgmr.msrb.gmra.mxu2 %vm659_vm1, %v5942_v56  ;;  %v4151_v43 = vor.u32 %v4906_v36, %v4148_v34  ;;  %v4216_v36 = vld [vmem:[%s5557_s17 + $0x4f8] sm:$0xf0]  ;;  %v4921_v34 = vld [vmem:[%s5557_s17 + $0x4e4] sm:$0xf] }
 0x14a   : > { %3951 = vmatmul.msk.bf16.vlgmr.msrb.gmra.mxu3 %vm659_vm1, %v5942_v56  ;;  %1760 = vmatpush.bf16.msrb.mxu2 %v4079_v44  ;;  %v4048_v56 = vld [vmem:[%s5557_s17 + $0x3b8] sm:$0xf0]  ;;  %v4902_v44 = vld [vmem:[%s5557_s17 + $0x44c] sm:$0xf]  ;;  %v4211_v19 = vor.u32 %v4921_v34, %v4208_v38 }
 0x14b   : > { %1773 = vmatpush.bf16.msrb.mxu3 %v4083_v50  ;;  %1747 = vmatpush.bf16.msrb.mxu1 %v4075_v51  ;;  %v4051_v15 = vor.u32 %v4882_v54, %v4048_v56  ;;  %v4447_v50 = vor.u32 %v4979_v41, %v4446_v40  ;;  %v4132_v51 = vld [vmem:[%s5557_s17 + $0x458] sm:$0xf0]  ;;  %v4897_v54 = vld [vmem:[%s5557_s17 + $0x424] sm:$0xf]  ;;  %v4514_v40 = vld [vmem:[%s5557_s17 + $0x720] sm:$0xf] }
 0x14c   : > { %2516 = vmatpush.bf16.msrb.mxu0 %v4379_v57  ;;  %v4430_v57 = vld [vmem:[%s5557_s17 + $0x680] sm:$0xf]  ;;  %v4135_v30 = vor.u32 %v4902_v44, %v4132_v51  ;;  %v4111_v63 = vor.u32 %v4897_v54, %v4108_v6  ;;  %v4995_v41 = vld [vmem:[%s5557_s17 + $0x72c] sm:$0xf0]  ;;  %v4920_v44 = vld [vmem:[%s5557_s17 + $0x4d4] sm:$0xf0] }
 0x14d   : > { %v4515_v51 = vor.u32 %v4995_v41, %v4514_v40  ;;  %v523_v61 = vpop.f32.mrf.mxu0  ;;  %v4199_v62 = vor.u32 %v4920_v44, %v4198_v48  ;;  %v4184_v6 = vld [vmem:[%s5557_s17 + $0x4b8] sm:$0xf0]  ;;  %v4938_v34 = vld [vmem:[%s5557_s17 + $0x56c] sm:$0xf]  ;;  %v4937_v40 = vld [vmem:[%s5557_s17 + $0x564] sm:$0xf] }
 0x14e   : > { %1761 = vmatpush.bf16.msrb.mxu2 %v4063_v1  ;;  %v4898_v1 = vld [vmem:[%s5557_s17 + $0x42c] sm:$0xf]  ;;  %v4276_v41 = vld [vmem:[%s5557_s17 + $0x570] sm:$0xf0]  ;;  %v5011_v48 = vld [vmem:[%s5557_s17 + $0x7ac] sm:$0xf0] }
 0x14f   : > { %1774 = vmatpush.bf16.msrb.mxu3 %v4067_v4  ;;  %1748 = vmatpush.bf16.msrb.mxu1 %v4059_v5  ;;  %v4431_v5 = vor.u32 %v4975_v59, %v4430_v57  ;;  %v542_v57 = vmax.f32 %v521_v7, 0.0  ;;  %v4498_v59 = vld [vmem:[%s5557_s17 + $0x700] sm:$0xf]  ;;  %v4284_v7 = vld [vmem:[%s5557_s17 + $0x578] sm:$0xf0]  ;;  %v4279_v53 = vor.u32 %v4937_v40, %v4276_v41 }
 0x150   : > { %2517 = vmatpush.bf16.msrb.mxu0 %v4363_v9  ;;  %v4344_v40 = vld [vmem:[%s5557_s17 + $0x5f0] sm:$0xf0] }
 0x151   : > { %4356 = vmatmul.msk.bf16.vlgmr.msra.gmra.mxu0 %vm659_vm1, %v6011_v58 }
 0x152   : > { %1762 = vmatpush.bf16.msrb.mxu2 %v4047_v12  ;;  %v4098_v12 = vld [vmem:[%s5557_s17 + $0x408] sm:$0xf] }
 0x153   : > { %1775 = vmatpush.bf16.msrb.mxu3 %v4051_v15  ;;  %1749 = vmatpush.bf16.msrb.mxu1 %v4043_v16  ;;  %v4894_v15 = vld [vmem:[%s5557_s17 + $0x40c] sm:$0xf]  ;;  %v4530_v16 = vld [vmem:[%s5557_s17 + $0x740] sm:$0xf] }
 0x154   : > { %2670 = vmatpush.bf16.msra.mxu0 %v4479_v13  ;;  %v4896_v13 = vld [vmem:[%s5557_s17 + $0x414] sm:$0xf0]  ;;  %v4531_v27 = vor.u32 %v4999_v20, %v4530_v16  ;;  %v4166_v20 = vld [vmem:[%s5557_s17 + $0x488] sm:$0xf] }
 0x155   : > { %v4099_v26 = vor.u32 %v4896_v13, %v4098_v12 }
 0x156   : > { %v6032_v45 = vpop.f32.mrf.mxu1  ;;  %1763 = vmatpush.bf16.msrb.mxu2 %v4031_v28  ;;  %v4103_v28 = vor.u32 %v4894_v15, %v4100_v22  ;;  %v4187_v22 = vor.u32 %v4914_v3, %v4184_v6 }
 0x157   : > { %1776 = vmatpush.bf16.msrb.mxu3 %v4035_v31  ;;  %1750 = vmatpush.bf16.msrb.mxu1 %v4027_v33  ;;  %v4214_v31 = vld [vmem:[%s5557_s17 + $0x4e8] sm:$0xf]  ;;  %v4924_v33 = vld [vmem:[%s5557_s17 + $0x4f4] sm:$0xf0] }
 0x158   : > { %2671 = vmatpush.bf16.msra.mxu0 %v4463_v29  ;;  %v4095_v29 = vor.u32 %v4893_v23, %v4092_v24  ;;  %v4910_v24 = vld [vmem:[%s5557_s17 + $0x48c] sm:$0xf] }
 0x159   : > { %4017 = vmatmul.msk.bf16.vlgmr.msra.gmra.mxu1 %vm659_vm1, %v5784_v49  ;;  %4018 = vmatmul.msk.bf16.vlgmr.msra.gmra.mxu2 %vm659_vm1, %v5784_v49 }
 0x15a   : > { %4019 = vmatmul.msk.bf16.vlgmr.msra.gmra.mxu3 %vm659_vm1, %v5784_v49  ;;  %1916 = vmatpush.bf16.msra.mxu2 %v4147_v42  ;;  %v4116_v49 = vld [vmem:[%s5557_s17 + $0x438] sm:$0xf0] }
 0x15b   : > { %1929 = vmatpush.bf16.msra.mxu3 %v4151_v43  ;;  %1903 = vmatpush.bf16.msra.mxu1 %v4143_v47  ;;  %v4119_v14 = vor.u32 %v4898_v1, %v4116_v49  ;;  %v4215_v43 = vor.u32 %v4924_v33, %v4214_v31  ;;  %v4219_v47 = vor.u32 %v4922_v17, %v4216_v36  ;;  %v5019_v49 = vld [vmem:[%s5557_s17 + $0x7ec] sm:$0xf0]  ;;  %v4940_v36 = vld [vmem:[%s5557_s17 + $0x574] sm:$0xf0] }
 0x15c   : > { %v6053_v4 = vpop.f32.mrf.mxu2  ;;  %2672 = vmatpush.bf16.msra.mxu0 %v4447_v50  ;;  %v4918_v50 = vld [vmem:[%s5557_s17 + $0x4cc] sm:$0xf] }
 0x15d   : > { %v6060_v9 = vpop.f32.mrf.mxu3  ;;  %v4203_v1 = vor.u32 %v4918_v50, %v4200_v52  ;;  %v4287_v52 = vor.u32 %v4938_v34, %v4284_v7  ;;  %v4953_v7 = vld [vmem:[%s5557_s17 + $0x5e4] sm:$0xf] }
 0x15e   : > { %v674_v56 = vpop.f32.mrf.mxu1  ;;  %1917 = vmatpush.bf16.msra.mxu2 %v4131_v60  ;;  %v4991_v60 = vld [vmem:[%s5557_s17 + $0x70c] sm:$0xf0] }
 0x15f   : > { %1930 = vmatpush.bf16.msra.mxu3 %v4135_v30  ;;  %1904 = vmatpush.bf16.msra.mxu1 %v4127_v0  ;;  %v4182_v30 = vld [vmem:[%s5557_s17 + $0x4a8] sm:$0xf]  ;;  %v4916_v0 = vld [vmem:[%s5557_s17 + $0x4b4] sm:$0xf0]  ;;  %v4913_v56 = vld [vmem:[%s5557_s17 + $0x4a4] sm:$0xf] }
 0x160   : > { %2673 = vmatpush.bf16.msra.mxu0 %v4431_v5  ;;  %v4614_v5 = vld [vmem:[%s5557_s17 + $0x7e0] sm:$0xf]  ;;  %v4183_v15 = vor.u32 %v4916_v0, %v4182_v30  ;;  %v4260_v30 = vld [vmem:[%s5557_s17 + $0x550] sm:$0xf0] }
 0x161   : > { %4424 = vmatmul.msk.bf16.vlgmr.msrb.gmra.mxu0 %vm659_vm1, %v6058_v8  ;;  %v4615_v16 = vor.u32 %v5019_v49, %v4614_v5  ;;  %v4250_v49 = vld [vmem:[%s5557_s17 + $0x528] sm:$0xf] }
 0x162   : > { %1918 = vmatpush.bf16.msra.mxu2 %v4115_v10  ;;  %v4176_v10 = vld [vmem:[%s5557_s17 + $0x4b0] sm:$0xf0] }
 0x163   : > { %1931 = vmatpush.bf16.msra.mxu3 %v4119_v14  ;;  %1905 = vmatpush.bf16.msra.mxu1 %v4111_v63  ;;  %v4179_v23 = vor.u32 %v4913_v56, %v4176_v10  ;;  %v4252_v10 = vld [vmem:[%s5557_s17 + $0x538] sm:$0xf0] }
 0x164   : > { %2826 = vmatpush.bf16.msrb.mxu0 %v4547_v11  ;;  %v687_v35 = vpop.f32.mrf.mxu2  ;;  %v6105_v11 = vpack.c.bf16 %v542_v57, %v542_v57  ;;  %v4936_v57 = vld [vmem:[%s5557_s17 + $0x554] sm:$0xf0] }
 0x165   : > { %v700_v39 = vpop.f32.mrf.mxu3  ;;  %v4282_v35 = vld [vmem:[%s5557_s17 + $0x568] sm:$0xf] }
 0x166   : > { %v6081_v42 = vpop.f32.mrf.mxu1  ;;  %1919 = vmatpush.bf16.msra.mxu2 %v4099_v26  ;;  %v5015_v26 = vld [vmem:[%s5557_s17 + $0x7cc] sm:$0xf0]  ;;  %v6126_v39 = vpop.f32.mrf.mxu0  ;;  %v4283_v50 = vor.u32 %v4940_v36, %v4282_v35  ;;  %v4956_v35 = vld [vmem:[%s5557_s17 + $0x5f4] sm:$0xf0]  ;;  %v4954_v36 = vld [vmem:[%s5557_s17 + $0x5ec] sm:$0xf] }
 0x167   : > { %1932 = vmatpush.bf16.msra.mxu3 %v4103_v28  ;;  %1906 = vmatpush.bf16.msra.mxu1 %v4095_v29  ;;  %v4160_v28 = vld [vmem:[%s5557_s17 + $0x490] sm:$0xf0]  ;;  %v4167_v29 = vor.u32 %v4912_v21, %v4166_v20  ;;  %v527_v41 = vadd.f32 %v5984_v46, %v6126_v39  ;;  %v4949_v39 = vld [vmem:[%s5557_s17 + $0x5c4] sm:$0xf] }
 0x168   : > { %2827 = vmatpush.bf16.msrb.mxu0 %v4531_v27  ;;  %v4909_v27 = vld [vmem:[%s5557_s17 + $0x484] sm:$0xf] }
 0x169   : > { %4085 = vmatmul.msk.bf16.vlgmr.msrb.gmra.mxu1 %vm659_vm1, %v5827_v37  ;;  %4086 = vmatmul.msk.bf16.vlgmr.msrb.gmra.mxu2 %vm659_vm1, %v5827_v37  ;;  %v4163_v17 = vor.u32 %v4909_v27, %v4160_v28  ;;  %v4925_v27 = vld [vmem:[%s5557_s17 + $0x504] sm:$0xf]  ;;  %v4228_v28 = vld [vmem:[%s5557_s17 + $0x510] sm:$0xf0] }
 0x16a   : > { %4087 = vmatmul.msk.bf16.vlgmr.msrb.gmra.mxu3 %vm659_vm1, %v5827_v37  ;;  %2072 = vmatpush.bf16.msrb.mxu2 %v4215_v43  ;;  %v4499_v37 = vor.u32 %v4991_v60, %v4498_v59  ;;  %v524_v43 = vadd.f32 %v5984_v46, %v523_v61  ;;  %v4934_v59 = vld [vmem:[%s5557_s17 + $0x54c] sm:$0xf]  ;;  %v4268_v61 = vld [vmem:[%s5557_s17 + $0x558] sm:$0xf0] }
 0x16b   : > { %2085 = vmatpush.bf16.msrb.mxu3 %v4219_v47  ;;  %2059 = vmatpush.bf16.msrb.mxu1 %v4211_v19  ;;  %v4582_v19 = vld [vmem:[%s5557_s17 + $0x7a0] sm:$0xf]  ;;  %v4271_v3 = vor.u32 %v4934_v59, %v4268_v61  ;;  %v4336_v46 = vld [vmem:[%s5557_s17 + $0x5d8] sm:$0xf0]  ;;  %v4328_v59 = vld [vmem:[%s5557_s17 + $0x5d0] sm:$0xf0] }
 0x16c   : > { %v807_v54 = vpop.f32.mrf.mxu2  ;;  %2828 = vmatpush.bf16.msrb.mxu0 %v4515_v51  ;;  %v4583_v60 = vor.u32 %v5011_v48, %v4582_v19  ;;  %v543_v0 = vmax.f32 %v524_v43, 0.0 }
 0x16d   : > { %v6108_v12 = vadd.f32 %v807_v54, %v6032_v45  ;;  %v820_v13 = vpop.f32.mrf.mxu3  ;;  %v4598_v45 = vld [vmem:[%s5557_s17 + $0x7c0] sm:$0xf]  ;;  %v4932_v54 = vld [vmem:[%s5557_s17 + $0x534] sm:$0xf0] }
 0x16e   : > { %v6111_v14 = vadd.f32 %v820_v13, %v6053_v4  ;;  %v713_v63 = vpop.f32.mrf.mxu1  ;;  %2073 = vmatpush.bf16.msrb.mxu2 %v4199_v62  ;;  %v4168_v4 = vld [vmem:[%s5557_s17 + $0x498] sm:$0xf0]  ;;  %v4599_v31 = vor.u32 %v5015_v26, %v4598_v45  ;;  %v4933_v62 = vld [vmem:[%s5557_s17 + $0x544] sm:$0xf]  ;;  %v4234_v26 = vld [vmem:[%s5557_s17 + $0x508] sm:$0xf] }
 0x16f   : > { %2086 = vmatpush.bf16.msrb.mxu3 %v4203_v1  ;;  %2060 = vmatpush.bf16.msrb.mxu1 %v4195_v2  ;;  %v4171_v33 = vor.u32 %v4910_v24, %v4168_v4  ;;  %v5007_v1 = vld [vmem:[%s5557_s17 + $0x78c] sm:$0xf0]  ;;  %v4267_v2 = vor.u32 %v4936_v57, %v4266_v55  ;;  %v4263_v5 = vor.u32 %v4933_v62, %v4260_v30  ;;  %v4929_v13 = vld [vmem:[%s5557_s17 + $0x524] sm:$0xf]  ;;  %v4244_v63 = vld [vmem:[%s5557_s17 + $0x530] sm:$0xf0] }
 0x170   : > { %2829 = vmatpush.bf16.msrb.mxu0 %v4499_v37  ;;  %v4930_v37 = vld [vmem:[%s5557_s17 + $0x52c] sm:$0xf]  ;;  %v4247_v45 = vor.u32 %v4929_v13, %v4244_v63  ;;  %v4952_v55 = vld [vmem:[%s5557_s17 + $0x5d4] sm:$0xf0]  ;;  %v4331_v62 = vor.u32 %v4949_v39, %v4328_v59  ;;  %v4318_v30 = vld [vmem:[%s5557_s17 + $0x5a8] sm:$0xf] }
 0x171   : > { %4492 = vmatmul.msk.bf16.vlgmr.msra.gmra.mxu0 %vm659_vm1, %v6105_v11  ;;  %v4255_v24 = vor.u32 %v4930_v37, %v4252_v10  ;;  %v4926_v4 = vld [vmem:[%s5557_s17 + $0x50c] sm:$0xf]  ;;  %v4388_v59 = vld [vmem:[%s5557_s17 + $0x638] sm:$0xf0] }
 0x172   : > { %2074 = vmatpush.bf16.msrb.mxu2 %v4183_v15  ;;  %v6157_v15 = vpack.c.bf16 %v543_v0, %v543_v0  ;;  %v4950_v57 = vld [vmem:[%s5557_s17 + $0x5cc] sm:$0xf]  ;;  %v4948_v0 = vld [vmem:[%s5557_s17 + $0x5b4] sm:$0xf0] }
 0x173   : > { %2087 = vmatpush.bf16.msrb.mxu3 %v4187_v22  ;;  %2061 = vmatpush.bf16.msrb.mxu1 %v4179_v23  ;;  %v4251_v23 = vor.u32 %v4932_v54, %v4250_v49  ;;  %v4339_v61 = vor.u32 %v4950_v57, %v4336_v46  ;;  %v4319_v10 = vor.u32 %v4948_v0, %v4318_v30  ;;  %v4964_v57 = vld [vmem:[%s5557_s17 + $0x634] sm:$0xf0]  ;;  %v4962_v46 = vld [vmem:[%s5557_s17 + $0x62c] sm:$0xf] }
 0x174   : > { %2982 = vmatpush.bf16.msra.mxu0 %v4615_v16  ;;  %v809_v38 = vpop.f32.mrf.mxu2 }
 0x175   : > { %v822_v47 = vpop.f32.mrf.mxu3  ;;  %v4352_v38 = vld [vmem:[%s5557_s17 + $0x5f8] sm:$0xf0] }
 0x176   : > { %v833_v44 = vpop.f32.mrf.mxu1  ;;  %2075 = vmatpush.bf16.msrb.mxu2 %v4167_v29 }
 0x177   : > { %v6135_v51 = vadd.f32 %v833_v44, %v6060_v9  ;;  %2088 = vmatpush.bf16.msrb.mxu3 %v4171_v33  ;;  %2062 = vmatpush.bf16.msrb.mxu1 %v4163_v17  ;;  %v4566_v9 = vld [vmem:[%s5557_s17 + $0x780] sm:$0xf]  ;;  %v4231_v33 = vor.u32 %v4925_v27, %v4228_v28  ;;  %v4350_v17 = vld [vmem:[%s5557_s17 + $0x5e8] sm:$0xf]  ;;  %v4970_v27 = vld [vmem:[%s5557_s17 + $0x66c] sm:$0xf] }
 0x178   : > { %2983 = vmatpush.bf16.msra.mxu0 %v4599_v31  ;;  %v4567_v56 = vor.u32 %v5007_v1, %v4566_v9  ;;  %v4351_v48 = vor.u32 %v4956_v35, %v4350_v17  ;;  %v4946_v9 = vld [vmem:[%s5557_s17 + $0x5ac] sm:$0xf] }
 0x179   : > { %4153 = vmatmul.msk.bf16.vlgmr.msra.gmra.mxu1 %vm659_vm1, %v5874_v32  ;;  %4154 = vmatmul.msk.bf16.vlgmr.msra.gmra.mxu2 %vm659_vm1, %v5874_v32 }
 0x17a   : > { %4155 = vmatmul.msk.bf16.vlgmr.msra.gmra.mxu3 %vm659_vm1, %v5874_v32  ;;  %2228 = vmatpush.bf16.msra.mxu2 %v4283_v50  ;;  %v4355_v50 = vor.u32 %v4954_v36, %v4352_v38 }
 0x17b   : > { %2241 = vmatpush.bf16.msra.mxu3 %v4287_v52  ;;  %2215 = vmatpush.bf16.msra.mxu1 %v4279_v53  ;;  %v4347_v52 = vor.u32 %v4953_v7, %v4344_v40  ;;  %v4334_v53 = vld [vmem:[%s5557_s17 + $0x5c8] sm:$0xf] }
 0x17c   : > { %v846_v6 = vpop.f32.mrf.mxu2  ;;  %2984 = vmatpush.bf16.msra.mxu0 %v4583_v60  ;;  %v544_v60 = vmax.f32 %v527_v41, 0.0  ;;  %v4402_v41 = vld [vmem:[%s5557_s17 + $0x648] sm:$0xf] }
 0x17d   : > { %v6160_v32 = vadd.f32 %v846_v6, %v6081_v42  ;;  %v959_v16 = vpop.f32.mrf.mxu3  ;;  %v4928_v42 = vld [vmem:[%s5557_s17 + $0x514] sm:$0xf0] }
 0x17e   : > { %v6163_v20 = vadd.f32 %v959_v16, %v6108_v12  ;;  %v835_v21 = vpop.f32.mrf.mxu1  ;;  %v6165_v22 = vpop.f32.mrf.mxu0  ;;  %2229 = vmatpush.bf16.msra.mxu2 %v4267_v2  ;;  %v4236_v12 = vld [vmem:[%s5557_s17 + $0x518] sm:$0xf0]  ;;  %v4235_v29 = vor.u32 %v4928_v42, %v4234_v26  ;;  %v6204_v49 = vpack.c.bf16 %v544_v60, %v544_v60  ;;  %v4302_v16 = vld [vmem:[%s5557_s17 + $0x588] sm:$0xf]  ;;  %v4961_v60 = vld [vmem:[%s5557_s17 + $0x624] sm:$0xf] }
 0x17f   : > { %2242 = vmatpush.bf16.msra.mxu3 %v4271_v3  ;;  %2216 = vmatpush.bf16.msra.mxu1 %v4263_v5  ;;  %v4239_v31 = vor.u32 %v4926_v4, %v4236_v12  ;;  %v4320_v2 = vld [vmem:[%s5557_s17 + $0x5b8] sm:$0xf0]  ;;  %v4945_v3 = vld [vmem:[%s5557_s17 + $0x5a4] sm:$0xf]  ;;  %v4312_v5 = vld [vmem:[%s5557_s17 + $0x5b0] sm:$0xf0] }
 0x180   : > { %2985 = vmatpush.bf16.msra.mxu0 %v4567_v56  ;;  %v4323_v13 = vor.u32 %v4946_v9, %v4320_v2  ;;  %v4315_v63 = vor.u32 %v4945_v3, %v4312_v5  ;;  %v4942_v21 = vld [vmem:[%s5557_s17 + $0x58c] sm:$0xf]  ;;  %v4418_v4 = vld [vmem:[%s5557_s17 + $0x668] sm:$0xf]  ;;  %v4972_v12 = vld [vmem:[%s5557_s17 + $0x674] sm:$0xf0] }
 0x181   : > { %4560 = vmatmul.msk.bf16.vlgmr.msrb.gmra.mxu0 %vm659_vm1, %v6157_v15  ;;  %v4370_v3 = vld [vmem:[%s5557_s17 + $0x608] sm:$0xf]  ;;  %v4958_v5 = vld [vmem:[%s5557_s17 + $0x60c] sm:$0xf] }
 0x182   : > { %2230 = vmatpush.bf16.msra.mxu2 %v4251_v23  ;;  %v4304_v23 = vld [vmem:[%s5557_s17 + $0x598] sm:$0xf0] }
 0x183   : > { %2243 = vmatpush.bf16.msra.mxu3 %v4255_v24  ;;  %2217 = vmatpush.bf16.msra.mxu1 %v4247_v45  ;;  %v4296_v24 = vld [vmem:[%s5557_s17 + $0x590] sm:$0xf0]  ;;  %v4307_v26 = vor.u32 %v4942_v21, %v4304_v23  ;;  %v4986_v21 = vld [vmem:[%s5557_s17 + $0x6ec] sm:$0xf] }
 0x184   : > { %v848_v34 = vpop.f32.mrf.mxu2 }
 0x185   : > { %v961_v43 = vpop.f32.mrf.mxu3  ;;  %v4419_v34 = vor.u32 %v4972_v12, %v4418_v4 }
 0x186   : > { %v972_v47 = vpop.f32.mrf.mxu1  ;;  %v1585_v19 = vpop.f32.mrf.mxu0  ;;  %2231 = vmatpush.bf16.msra.mxu2 %v4235_v29  ;;  %v4420_v29 = vld [vmem:[%s5557_s17 + $0x678] sm:$0xf0]  ;;  %v4968_v43 = vld [vmem:[%s5557_s17 + $0x654] sm:$0xf0] }
 0x187   : > { %v6184_v44 = vadd.f32 %v972_v47, %v6111_v14  ;;  %2244 = vmatpush.bf16.msra.mxu3 %v4239_v31  ;;  %2218 = vmatpush.bf16.msra.mxu1 %v4231_v33  ;;  %v4335_v14 = vor.u32 %v4952_v55, %v4334_v53  ;;  %v4969_v31 = vld [vmem:[%s5557_s17 + $0x664] sm:$0xf]  ;;  %v4412_v33 = vld [vmem:[%s5557_s17 + $0x670] sm:$0xf0]  ;;  %v4423_v7 = vor.u32 %v4970_v27, %v4420_v29  ;;  %v4966_v47 = vld [vmem:[%s5557_s17 + $0x64c] sm:$0xf] }
 0x188   : > { %v4415_v40 = vor.u32 %v4969_v31, %v4412_v33  ;;  %v4404_v19 = vld [vmem:[%s5557_s17 + $0x658] sm:$0xf0]  ;;  %v4386_v55 = vld [vmem:[%s5557_s17 + $0x628] sm:$0xf]  ;;  %v4984_v33 = vld [vmem:[%s5557_s17 + $0x6d4] sm:$0xf0] }
 0x189   : > { %4221 = vmatmul.msk.bf16.vlgmr.msrb.gmra.mxu1 %vm659_vm1, %v5919_v25  ;;  %4222 = vmatmul.msk.bf16.vlgmr.msrb.gmra.mxu2 %vm659_vm1, %v5919_v25  ;;  %v4387_v9 = vor.u32 %v4964_v57, %v4386_v55  ;;  %v4470_v31 = vld [vmem:[%s5557_s17 + $0x6c8] sm:$0xf] }
 0x18a   : > { %4223 = vmatmul.msk.bf16.vlgmr.msrb.gmra.mxu3 %vm659_vm1, %v5919_v25  ;;  %2384 = vmatpush.bf16.msrb.mxu2 %v4351_v48  ;;  %v4965_v48 = vld [vmem:[%s5557_s17 + $0x644] sm:$0xf] }
 0x18b   : > { %2397 = vmatpush.bf16.msrb.mxu3 %v4355_v50  ;;  %2371 = vmatpush.bf16.msrb.mxu1 %v4347_v52  ;;  %v4396_v50 = vld [vmem:[%s5557_s17 + $0x650] sm:$0xf0]  ;;  %v4407_v52 = vor.u32 %v4966_v47, %v4404_v19  ;;  %v4978_v47 = vld [vmem:[%s5557_s17 + $0x6ac] sm:$0xf] }
 0x18c   : > { %v985_v1 = vpop.f32.mrf.mxu2  ;;  %v4399_v53 = vor.u32 %v4965_v48, %v4396_v50  ;;  %v4456_v48 = vld [vmem:[%s5557_s17 + $0x6b8] sm:$0xf0]  ;;  %v4977_v50 = vld [vmem:[%s5557_s17 + $0x6a4] sm:$0xf] }
 0x18d   : > { %v6207_v25 = vadd.f32 %v985_v1, %v6135_v51  ;;  %v998_v54 = vpop.f32.mrf.mxu3  ;;  %v4944_v51 = vld [vmem:[%s5557_s17 + $0x594] sm:$0xf0]  ;;  %v4391_v1 = vor.u32 %v4962_v46, %v4388_v59 }
 0x18e   : > { %v6210_v37 = vadd.f32 %v998_v54, %v6160_v32  ;;  %v974_v6 = vpop.f32.mrf.mxu1  ;;  %v6212_v56 = vpop.f32.mrf.mxu0  ;;  %2385 = vmatpush.bf16.msrb.mxu2 %v4335_v14  ;;  %v4941_v32 = vld [vmem:[%s5557_s17 + $0x584] sm:$0xf]  ;;  %v4303_v45 = vor.u32 %v4944_v51, %v4302_v16  ;;  %v4380_v14 = vld [vmem:[%s5557_s17 + $0x630] sm:$0xf0]  ;;  %v4486_v16 = vld [vmem:[%s5557_s17 + $0x6e8] sm:$0xf] }
 0x18f   : > { %2398 = vmatpush.bf16.msrb.mxu3 %v4339_v61  ;;  %2372 = vmatpush.bf16.msrb.mxu1 %v4331_v62  ;;  %v4299_v42 = vor.u32 %v4941_v32, %v4296_v24  ;;  %v4383_v2 = vor.u32 %v4961_v60, %v4380_v14  ;;  %v4957_v54 = vld [vmem:[%s5557_s17 + $0x604] sm:$0xf]  ;;  %v4364_v6 = vld [vmem:[%s5557_s17 + $0x610] sm:$0xf0]  ;;  %v4988_v51 = vld [vmem:[%s5557_s17 + $0x6f4] sm:$0xf0] }
 0x190   : > { %v4488_v32 = vld [vmem:[%s5557_s17 + $0x6f8] sm:$0xf0]  ;;  %v4985_v24 = vld [vmem:[%s5557_s17 + $0x6e4] sm:$0xf]  ;;  %v4487_v12 = vor.u32 %v4988_v51, %v4486_v16  ;;  %v4438_v60 = vld [vmem:[%s5557_s17 + $0x688] sm:$0xf] }
 0x191   : > { %4628 = vmatmul.msk.bf16.vlgmr.msra.gmra.mxu0 %vm659_vm1, %v6204_v49  ;;  %v4974_v14 = vld [vmem:[%s5557_s17 + $0x68c] sm:$0xf] }
 0x192   : > { %2386 = vmatpush.bf16.msrb.mxu2 %v4319_v10 }
 0x193   : > { %2399 = vmatpush.bf16.msrb.mxu3 %v4323_v13  ;;  %2373 = vmatpush.bf16.msrb.mxu1 %v4315_v63  ;;  %v4367_v63 = vor.u32 %v4957_v54, %v4364_v6  ;;  %v4556_v54 = vld [vmem:[%s5557_s17 + $0x778] sm:$0xf0]  ;;  %v5001_v6 = vld [vmem:[%s5557_s17 + $0x764] sm:$0xf] }
 0x194   : > { %v987_v28 = vpop.f32.mrf.mxu2 }
 0x195   : > { %v1000_v17 = vpop.f32.mrf.mxu3  ;;  %v4491_v28 = vor.u32 %v4986_v21, %v4488_v32 }
 0x196   : > { %v1115_v35 = vpop.f32.mrf.mxu1  ;;  %v1741_v36 = vpop.f32.mrf.mxu0  ;;  %2387 = vmatpush.bf16.msrb.mxu2 %v4303_v45  ;;  %v4480_v45 = vld [vmem:[%s5557_s17 + $0x6f0] sm:$0xf0]  ;;  %v4982_v17 = vld [vmem:[%s5557_s17 + $0x6cc] sm:$0xf] }
 0x197   : > { %v6229_v38 = vadd.f32 %v1115_v35, %v6163_v20  ;;  %2400 = vmatpush.bf16.msrb.mxu3 %v4307_v26  ;;  %2374 = vmatpush.bf16.msrb.mxu1 %v4299_v42  ;;  %v4403_v20 = vor.u32 %v4968_v43, %v4402_v41  ;;  %v4483_v29 = vor.u32 %v4985_v24, %v4480_v45  ;;  %v4472_v35 = vld [vmem:[%s5557_s17 + $0x6d8] sm:$0xf0]  ;;  %v4981_v36 = vld [vmem:[%s5557_s17 + $0x6c4] sm:$0xf]  ;;  %v4454_v41 = vld [vmem:[%s5557_s17 + $0x6a8] sm:$0xf] }
 0x198   : > { %v4980_v43 = vld [vmem:[%s5557_s17 + $0x6b4] sm:$0xf0]  ;;  %v4538_v24 = vld [vmem:[%s5557_s17 + $0x748] sm:$0xf] }
 0x199   : > { %4289 = vmatmul.msk.bf16.vlgmr.msra.gmra.mxu1 %vm659_vm1, %v5966_v18  ;;  %4290 = vmatmul.msk.bf16.vlgmr.msra.gmra.mxu2 %vm659_vm1, %v5966_v18  ;;  %v4455_v46 = vor.u32 %v4980_v43, %v4454_v41  ;;  %v5000_v45 = vld [vmem:[%s5557_s17 + $0x754] sm:$0xf0] }
 0x19a   : > { %4291 = vmatmul.msk.bf16.vlgmr.msra.gmra.mxu3 %vm659_vm1, %v5966_v18  ;;  %2540 = vmatpush.bf16.msra.mxu2 %v4419_v34  ;;  %v4464_v34 = vld [vmem:[%s5557_s17 + $0x6d0] sm:$0xf0] }
 0x19b   : > { %2553 = vmatpush.bf16.msra.mxu3 %v4423_v7  ;;  %2527 = vmatpush.bf16.msra.mxu1 %v4415_v40  ;;  %v4475_v7 = vor.u32 %v4982_v17, %v4472_v35  ;;  %v4467_v40 = vor.u32 %v4981_v36, %v4464_v34  ;;  %v4994_v17 = vld [vmem:[%s5557_s17 + $0x72c] sm:$0xf]  ;;  %v4524_v36 = vld [vmem:[%s5557_s17 + $0x738] sm:$0xf0]  ;;  %v4993_v34 = vld [vmem:[%s5557_s17 + $0x724] sm:$0xf] }
 0x19c   : > { %v1128_v39 = vpop.f32.mrf.mxu2 }
 0x19d   : > { %v6250_v18 = vadd.f32 %v1128_v39, %v6184_v44  ;;  %v1141_v61 = vpop.f32.mrf.mxu3  ;;  %v4960_v44 = vld [vmem:[%s5557_s17 + $0x614] sm:$0xf0]  ;;  %v4459_v39 = vor.u32 %v4978_v47, %v4456_v48 }
 0x19e   : > { %v6253_v62 = vadd.f32 %v1141_v61, %v6207_v25  ;;  %v1117_v30 = vpop.f32.mrf.mxu1  ;;  %v6255_v0 = vpop.f32.mrf.mxu0  ;;  %2541 = vmatpush.bf16.msra.mxu2 %v4403_v20  ;;  %v4372_v25 = vld [vmem:[%s5557_s17 + $0x618] sm:$0xf0]  ;;  %v4371_v10 = vor.u32 %v4960_v44, %v4370_v3  ;;  %v4448_v20 = vld [vmem:[%s5557_s17 + $0x6b0] sm:$0xf0]  ;;  %v4973_v61 = vld [vmem:[%s5557_s17 + $0x684] sm:$0xf] }
 0x19f   : > { %2554 = vmatpush.bf16.msra.mxu3 %v4407_v52  ;;  %2528 = vmatpush.bf16.msra.mxu1 %v4399_v53  ;;  %v4375_v13 = vor.u32 %v4958_v5, %v4372_v25  ;;  %v4451_v59 = vor.u32 %v4977_v50, %v4448_v20  ;;  %v4432_v30 = vld [vmem:[%s5557_s17 + $0x690] sm:$0xf0]  ;;  %v4554_v3 = vld [vmem:[%s5557_s17 + $0x768] sm:$0xf]  ;;  %v5004_v44 = vld [vmem:[%s5557_s17 + $0x774] sm:$0xf0] }
 0x1a0   : > { %v5002_v5 = vld [vmem:[%s5557_s17 + $0x76c] sm:$0xf]  ;;  %v4555_v51 = vor.u32 %v5004_v44, %v4554_v3  ;;  %v4506_v50 = vld [vmem:[%s5557_s17 + $0x708] sm:$0xf]  ;;  %v4992_v20 = vld [vmem:[%s5557_s17 + $0x714] sm:$0xf0] }
 0x1a2   : > { %2542 = vmatpush.bf16.msra.mxu2 %v4387_v9 }
 0x1a3   : > { %2555 = vmatpush.bf16.msra.mxu3 %v4391_v1  ;;  %2529 = vmatpush.bf16.msra.mxu1 %v4383_v2  ;;  %v4435_v2 = vor.u32 %v4973_v61, %v4432_v30  ;;  %v5018_v61 = vld [vmem:[%s5557_s17 + $0x7ec] sm:$0xf] }
 0x1a4   : > { %v1130_v23 = vpop.f32.mrf.mxu2 }
 0x1a5   : > { %v1143_v26 = vpop.f32.mrf.mxu3  ;;  %v4559_v23 = vor.u32 %v5002_v5, %v4556_v54 }
 0x1a6   : > { %v1154_v42 = vpop.f32.mrf.mxu1  ;;  %v1897_v4 = vpop.f32.mrf.mxu0  ;;  %2543 = vmatpush.bf16.msra.mxu2 %v4371_v10  ;;  %v4548_v10 = vld [vmem:[%s5557_s17 + $0x770] sm:$0xf0]  ;;  %v4998_v26 = vld [vmem:[%s5557_s17 + $0x74c] sm:$0xf] }
 0x1a7   : > { %v6270_v27 = vadd.f32 %v1154_v42, %v6210_v37  ;;  %2556 = vmatpush.bf16.msra.mxu3 %v4375_v13  ;;  %2530 = vmatpush.bf16.msra.mxu1 %v4367_v63  ;;  %v4471_v37 = vor.u32 %v4984_v33, %v4470_v31  ;;  %v4551_v32 = vor.u32 %v5001_v6, %v4548_v10  ;;  %v4540_v42 = vld [vmem:[%s5557_s17 + $0x758] sm:$0xf0]  ;;  %v4997_v4 = vld [vmem:[%s5557_s17 + $0x744] sm:$0xf]  ;;  %v4522_v31 = vld [vmem:[%s5557_s17 + $0x728] sm:$0xf] }
 0x1a8   : > { %v4996_v33 = vld [vmem:[%s5557_s17 + $0x734] sm:$0xf0]  ;;  %v4606_v10 = vld [vmem:[%s5557_s17 + $0x7c8] sm:$0xf] }
 0x1a9   : > { %4357 = vmatmul.msk.bf16.vlgmr.msrb.gmra.mxu1 %vm659_vm1, %v6011_v58  ;;  %4358 = vmatmul.msk.bf16.vlgmr.msrb.gmra.mxu2 %vm659_vm1, %v6011_v58  ;;  %v4523_v47 = vor.u32 %v4996_v33, %v4522_v31 }
 0x1aa   : > { %4359 = vmatmul.msk.bf16.vlgmr.msrb.gmra.mxu3 %vm659_vm1, %v6011_v58  ;;  %2696 = vmatpush.bf16.msrb.mxu2 %v4487_v12  ;;  %v4532_v12 = vld [vmem:[%s5557_s17 + $0x750] sm:$0xf0] }
 0x1ab   : > { %2709 = vmatpush.bf16.msrb.mxu3 %v4491_v28  ;;  %2683 = vmatpush.bf16.msrb.mxu1 %v4483_v29  ;;  %v4543_v28 = vor.u32 %v4998_v26, %v4540_v42  ;;  %v4535_v29 = vor.u32 %v4997_v4, %v4532_v12  ;;  %v5012_v26 = vld [vmem:[%s5557_s17 + $0x7b4] sm:$0xf0]  ;;  %v5010_v42 = vld [vmem:[%s5557_s17 + $0x7ac] sm:$0xf]  ;;  %v4592_v12 = vld [vmem:[%s5557_s17 + $0x7b8] sm:$0xf0] }
 0x1ac   : > { %v1271_v19 = vpop.f32.mrf.mxu2 }
 0x1ad   : > { %v6291_v58 = vadd.f32 %v1271_v19, %v6229_v38  ;;  %v1284_v52 = vpop.f32.mrf.mxu3  ;;  %v4976_v38 = vld [vmem:[%s5557_s17 + $0x694] sm:$0xf0]  ;;  %v4527_v19 = vor.u32 %v4994_v17, %v4524_v36  ;;  %v4595_v36 = vor.u32 %v5010_v42, %v4592_v12 }
 0x1ae   : > { %v6294_v53 = vadd.f32 %v1284_v52, %v6250_v18  ;;  %v1156_v55 = vpop.f32.mrf.mxu1  ;;  %v6296_v57 = vpop.f32.mrf.mxu0  ;;  %2697 = vmatpush.bf16.msrb.mxu2 %v4471_v37  ;;  %v4440_v18 = vld [vmem:[%s5557_s17 + $0x698] sm:$0xf0]  ;;  %v4439_v9 = vor.u32 %v4976_v38, %v4438_v60  ;;  %v4516_v37 = vld [vmem:[%s5557_s17 + $0x730] sm:$0xf0] }
 0x1af   : > { %2710 = vmatpush.bf16.msrb.mxu3 %v4475_v7  ;;  %2684 = vmatpush.bf16.msrb.mxu1 %v4467_v40  ;;  %v4443_v1 = vor.u32 %v4974_v14, %v4440_v18  ;;  %v4519_v48 = vor.u32 %v4993_v34, %v4516_v37  ;;  %v4508_v55 = vld [vmem:[%s5557_s17 + $0x718] sm:$0xf0]  ;;  %v4622_v14 = vld [vmem:[%s5557_s17 + $0x7e8] sm:$0xf]  ;;  %v5020_v18 = vld [vmem:[%s5557_s17 + $0x7f4] sm:$0xf0] }
 0x1b0   : > { %v4574_v37 = vld [vmem:[%s5557_s17 + $0x788] sm:$0xf] }
 0x1b2   : > { %2698 = vmatpush.bf16.msrb.mxu2 %v4455_v46  ;;  %v4500_v46 = vld [vmem:[%s5557_s17 + $0x710] sm:$0xf0] }
 0x1b3   : > { %2711 = vmatpush.bf16.msrb.mxu3 %v4459_v39  ;;  %2685 = vmatpush.bf16.msrb.mxu1 %v4451_v59  ;;  %v4507_v59 = vor.u32 %v4992_v20, %v4506_v50 }
 0x1b4   : > { %v1273_v25 = vpop.f32.mrf.mxu2 }
 0x1b5   : > { %v1286_v13 = vpop.f32.mrf.mxu3  ;;  %v4623_v25 = vor.u32 %v5020_v18, %v4622_v14 }
 0x1b6   : > { %v1297_v63 = vpop.f32.mrf.mxu1  ;;  %v2053_v16 = vpop.f32.mrf.mxu0  ;;  %2699 = vmatpush.bf16.msrb.mxu2 %v4439_v9  ;;  %v4624_v9 = vld [vmem:[%s5557_s17 + $0x7f8] sm:$0xf0]  ;;  %v5016_v13 = vld [vmem:[%s5557_s17 + $0x7d4] sm:$0xf0] }
 0x1b7   : > { %v6311_v21 = vadd.f32 %v1297_v63, %v6253_v62  ;;  %2712 = vmatpush.bf16.msrb.mxu3 %v4443_v1  ;;  %2686 = vmatpush.bf16.msrb.mxu1 %v4435_v2  ;;  %v4539_v62 = vor.u32 %v5000_v45, %v4538_v24  ;;  %v5017_v1 = vld [vmem:[%s5557_s17 + $0x7e4] sm:$0xf]  ;;  %v4616_v2 = vld [vmem:[%s5557_s17 + $0x7f0] sm:$0xf0]  ;;  %v5014_v63 = vld [vmem:[%s5557_s17 + $0x7cc] sm:$0xf] }
 0x1b8   : > { %v4619_v6 = vor.u32 %v5017_v1, %v4616_v2  ;;  %v4590_v45 = vld [vmem:[%s5557_s17 + $0x7a8] sm:$0xf] }
 0x1b9   : > { %4425 = vmatmul.msk.bf16.vlgmr.msra.gmra.mxu1 %vm659_vm1, %v6058_v8  ;;  %4426 = vmatmul.msk.bf16.vlgmr.msra.gmra.mxu2 %vm659_vm1, %v6058_v8 }
 0x1ba   : > { %4427 = vmatmul.msk.bf16.vlgmr.msra.gmra.mxu3 %vm659_vm1, %v6058_v8  ;;  %2852 = vmatpush.bf16.msra.mxu2 %v4555_v51  ;;  %v5013_v51 = vld [vmem:[%s5557_s17 + $0x7c4] sm:$0xf] }
 0x1bb   : > { %2865 = vmatpush.bf16.msra.mxu3 %v4559_v23  ;;  %2839 = vmatpush.bf16.msra.mxu1 %v4551_v32  ;;  %v4600_v23 = vld [vmem:[%s5557_s17 + $0x7d0] sm:$0xf0] }
 0x1bc   : > { %v1310_v35 = vpop.f32.mrf.mxu2  ;;  %v4603_v24 = vor.u32 %v5013_v51, %v4600_v23 }
 0x1bd   : > { %v6332_v7 = vadd.f32 %v1310_v35, %v6270_v27  ;;  %v1427_v8 = vpop.f32.mrf.mxu3  ;;  %v4990_v27 = vld [vmem:[%s5557_s17 + $0x70c] sm:$0xf]  ;;  %v4591_v35 = vor.u32 %v5012_v26, %v4590_v45 }
 0x1be   : > { %v1470_v40 = vadd.f32 %v1427_v8, %v6291_v58  ;;  %v1299_v41 = vpop.f32.mrf.mxu1  ;;  %v2207_v43 = vpop.f32.mrf.mxu0  ;;  %2853 = vmatpush.bf16.msra.mxu2 %v4539_v62  ;;  %v4989_v58 = vld [vmem:[%s5557_s17 + $0x704] sm:$0xf]  ;;  %v4511_v60 = vor.u32 %v4990_v27, %v4508_v55  ;;  %v5008_v8 = vld [vmem:[%s5557_s17 + $0x794] sm:$0xf0] }
 0x1bf   : > { %2866 = vmatpush.bf16.msra.mxu3 %v4543_v28  ;;  %2840 = vmatpush.bf16.msra.mxu1 %v4535_v29  ;;  %v4503_v38 = vor.u32 %v4989_v58, %v4500_v46  ;;  %v5009_v62 = vld [vmem:[%s5557_s17 + $0x7a4] sm:$0xf]  ;;  %v4584_v28 = vld [vmem:[%s5557_s17 + $0x7b0] sm:$0xf0]  ;;  %v4576_v41 = vld [vmem:[%s5557_s17 + $0x798] sm:$0xf0] }
 0x1c0   : > { %v1626_v52 = vadd.f32 %v6165_v22, %v1470_v40  ;;  %v4587_v34 = vor.u32 %v5009_v62, %v4584_v28  ;;  %v5006_v40 = vld [vmem:[%s5557_s17 + $0x78c] sm:$0xf] }
 0x1c2   : > { %v1782_v39 = vadd.f32 %v6212_v56, %v1626_v52  ;;  %2854 = vmatpush.bf16.msra.mxu2 %v4523_v47  ;;  %v4568_v47 = vld [vmem:[%s5557_s17 + $0x790] sm:$0xf0] }
 0x1c3   : > { %2867 = vmatpush.bf16.msra.mxu3 %v4527_v19  ;;  %2841 = vmatpush.bf16.msra.mxu1 %v4519_v48 }
 0x1c4   : > { %v1938_v30 = vadd.f32 %v6255_v0, %v1782_v39  ;;  %v1312_v22 = vpop.f32.mrf.mxu2  ;;  %v4627_v0 = vor.u32 %v5018_v61, %v4624_v9 }
 0x1c5   : > { %v1429_v56 = vpop.f32.mrf.mxu3 }
 0x1c6   : > { %v2094_v3 = vadd.f32 %v6296_v57, %v1938_v30  ;;  %v1440_v44 = vpop.f32.mrf.mxu1  ;;  %v2209_v5 = vpop.f32.mrf.mxu0  ;;  %2855 = vmatpush.bf16.msra.mxu2 %v4507_v59  ;;  %v4608_v57 = vld [vmem:[%s5557_s17 + $0x7d8] sm:$0xf0] }
 0x1c7   : > { %v1471_v54 = vadd.f32 %v1440_v44, %v6294_v53  ;;  %2868 = vmatpush.bf16.msra.mxu3 %v4511_v60  ;;  %2842 = vmatpush.bf16.msra.mxu1 %v4503_v38  ;;  %v4607_v53 = vor.u32 %v5016_v13, %v4606_v10  ;;  %v4611_v32 = vor.u32 %v5014_v63, %v4608_v57 }
 0x1c8   : > { %v6355_v16 = vadd.f32 %v2207_v43, %v2094_v3  ;;  %v5005_v43 = vld [vmem:[%s5557_s17 + $0x784] sm:$0xf] }
 0x1c9   : > { %4493 = vmatmul.msk.bf16.vlgmr.msrb.gmra.mxu1 %vm659_vm1, %v6105_v11  ;;  %4494 = vmatmul.msk.bf16.vlgmr.msrb.gmra.mxu2 %vm659_vm1, %v6105_v11  ;;  %v4571_v19 = vor.u32 %v5005_v43, %v4568_v47 }
 0x1ca   : > { %4495 = vmatmul.msk.bf16.vlgmr.msrb.gmra.mxu3 %vm659_vm1, %v6105_v11  ;;  %3008 = vmatpush.bf16.msrb.mxu2 %v4623_v25 }
 0x1cb   : > { %3021 = vmatpush.bf16.msrb.mxu3 %v4627_v0  ;;  %2995 = vmatpush.bf16.msrb.mxu1 %v4619_v6 }
 0x1cc   : > { %v1453_v4 = vpop.f32.mrf.mxu2 }
 0x1cd   : > { %v1472_v11 = vadd.f32 %v1453_v4, %v6311_v21  ;;  %v1466_v29 = vpop.f32.mrf.mxu3  ;;  %v4575_v21 = vor.u32 %v5008_v8, %v4574_v37 }
 0x1ce   : > { %v1473_v31 = vadd.f32 %v1466_v29, %v6332_v7  ;;  %v1442_v33 = vpop.f32.mrf.mxu1  ;;  %v6374_v17 = vpop.f32.mrf.mxu0  ;;  %3009 = vmatpush.bf16.msrb.mxu2 %v4607_v53  ;;  %v4579_v7 = vor.u32 %v5006_v40, %v4576_v41 }
 0x1cf   : > { %3022 = vmatpush.bf16.msrb.mxu3 %v4611_v32  ;;  %2996 = vmatpush.bf16.msrb.mxu1 %v4603_v24  ;;  %v2406_v32 = vadd.f32 %v6374_v17, %v6355_v16 }
 0x1d2   : > { %3010 = vmatpush.bf16.msrb.mxu2 %v4591_v35 }
 0x1d3   : > { %3023 = vmatpush.bf16.msrb.mxu3 %v4595_v36  ;;  %2997 = vmatpush.bf16.msrb.mxu1 %v4587_v34 }
 0x1d4   : > { %v1455_v48 = vpop.f32.mrf.mxu2 }
 0x1d5   : > { %v1468_v50 = vpop.f32.mrf.mxu3 }
 0x1d6   : > { %v1596_v20 = vpop.f32.mrf.mxu1  ;;  %v2365_v27 = vpop.f32.mrf.mxu0  ;;  %3011 = vmatpush.bf16.msrb.mxu2 %v4575_v21 }
 0x1d7   : > { %v1627_v52 = vadd.f32 %v1596_v20, %v1471_v54  ;;  %3024 = vmatpush.bf16.msrb.mxu3 %v4579_v7  ;;  %2998 = vmatpush.bf16.msrb.mxu1 %v4571_v19 }
 0x1d9   : > { %4561 = vmatmul.msk.bf16.vlgmr.msra.gmra.mxu1 %vm659_vm1, %v6157_v15  ;;  %4562 = vmatmul.msk.bf16.vlgmr.msra.gmra.mxu2 %vm659_vm1, %v6157_v15 }
 0x1da   : > { %4563 = vmatmul.msk.bf16.vlgmr.msra.gmra.mxu3 %vm659_vm1, %v6157_v15 }
 0x1dc   : > { %v1609_v55 = vpop.f32.mrf.mxu2 }
 0x1dd   : > { %v1628_v58 = vadd.f32 %v1609_v55, %v1472_v11  ;;  %v1622_v46 = vpop.f32.mrf.mxu3 }
 0x1de   : > { %v1629_v39 = vadd.f32 %v1622_v46, %v1473_v31  ;;  %v1598_v59 = vpop.f32.mrf.mxu1  ;;  %v2519_v60 = vpop.f32.mrf.mxu0  ;;  %v3034_v31 = vld [vmem:[#allocation2 + $0x10] sm:$0xff] }
 0x1df   : > { %v2562_v45 = vadd.f32 %v2519_v60, %v2406_v32 }
 0x1e4   : > { %v1611_v38 = vpop.f32.mrf.mxu2 }
 0x1e5   : > { %v1624_v14 = vpop.f32.mrf.mxu3 }
 0x1e6   : > { %v1752_v18 = vpop.f32.mrf.mxu1  ;;  %v2521_v61 = vpop.f32.mrf.mxu0 }
 0x1e7   : > { %v1783_v30 = vadd.f32 %v1752_v18, %v1627_v52 }
 0x1e9   : > { %4629 = vmatmul.msk.bf16.vlgmr.msrb.gmra.mxu1 %vm659_vm1, %v6204_v49  ;;  %4630 = vmatmul.msk.bf16.vlgmr.msrb.gmra.mxu2 %vm659_vm1, %v6204_v49 }
 0x1ea   : > { %4631 = vmatmul.msk.bf16.vlgmr.msrb.gmra.mxu3 %vm659_vm1, %v6204_v49 }
 0x1ec   : > { %v1765_v15 = vpop.f32.mrf.mxu2 }
 0x1ed   : > { %v1784_v22 = vadd.f32 %v1765_v15, %v1628_v58  ;;  %v1778_v9 = vpop.f32.mrf.mxu3 }
 0x1ee   : > { %v1785_v1 = vadd.f32 %v1778_v9, %v1629_v39  ;;  %v1754_v2 = vpop.f32.mrf.mxu1  ;;  %v2675_v56 = vpop.f32.mrf.mxu0 }
 0x1ef   : > { %v2718_v26 = vadd.f32 %v2675_v56, %v2562_v45 }
 0x1f4   : > { %v1767_v3 = vpop.f32.mrf.mxu2 }
 0x1f5   : > { %v1780_v44 = vpop.f32.mrf.mxu3 }
 0x1f6   : > { %v1908_v5 = vpop.f32.mrf.mxu1  ;;  %v2677_v25 = vpop.f32.mrf.mxu0 }
 0x1f7   : > { %v1939_v54 = vadd.f32 %v1908_v5, %v1783_v30 }
 0x1fc   : > { %v1921_v0 = vpop.f32.mrf.mxu2 }
 0x1fd   : > { %v1940_v6 = vadd.f32 %v1921_v0, %v1784_v22  ;;  %v1934_v10 = vpop.f32.mrf.mxu3 }
 0x1fe   : > { %v1941_v13 = vadd.f32 %v1934_v10, %v1785_v1  ;;  %v1910_v63 = vpop.f32.mrf.mxu1  ;;  %v2831_v57 = vpop.f32.mrf.mxu0 }
 0x1ff   : > { %v2874_v4 = vadd.f32 %v2831_v57, %v2718_v26  ;;  %v3036_v26 = vld [vmem:[#allocation2 + $0x18] sm:$0xff] }
 0x204   : > { %v1923_v51 = vpop.f32.mrf.mxu2 }
 0x205   : > { %v1936_v23 = vpop.f32.mrf.mxu3 }
 0x206   : > { %v2064_v49 = vpop.f32.mrf.mxu1  ;;  %v2833_v53 = vpop.f32.mrf.mxu0 }
 0x207   : > { %v2095_v24 = vadd.f32 %v2064_v49, %v1939_v54 }
 0x20c   : > { %v2077_v42 = vpop.f32.mrf.mxu2 }
 0x20d   : > { %v2096_v12 = vadd.f32 %v2077_v42, %v1940_v6  ;;  %v2090_v62 = vpop.f32.mrf.mxu3 }
 0x20e   : > { %v2097_v28 = vadd.f32 %v2090_v62, %v1941_v13  ;;  %v2066_v11 = vpop.f32.mrf.mxu1  ;;  %v2987_v29 = vpop.f32.mrf.mxu0  ;;  %v3035_v13 = vld [vmem:[#allocation2] sm:$0xff] }
 0x20f   : > { %v3030_v33 = vadd.f32 %v2987_v29, %v2874_v4 }
 0x211   : > { %v3038_v35 = vadd.f32 %v3034_v31, %v3030_v33 }
 0x213   : > { %3042 = vst [vmem:[#allocation2 + $0x10] sm:$0xff] %v3038_v35 }
 0x214   : > { %v2079_v36 = vpop.f32.mrf.mxu2 }
 0x215   : > { %v2092_v34 = vpop.f32.mrf.mxu3 }
 0x216   : > { %v2220_v37 = vpop.f32.mrf.mxu1  ;;  %v2989_v8 = vpop.f32.mrf.mxu0 }
 0x217   : > { %v2251_v40 = vadd.f32 %v2220_v37, %v2095_v24 }
 0x21c   : > { %v2233_v16 = vpop.f32.mrf.mxu2 }
 0x21d   : > { %v2252_v17 = vadd.f32 %v2233_v16, %v2096_v12  ;;  %v2246_v41 = vpop.f32.mrf.mxu3  ;;  %v3037_v12 = vld [vmem:[#allocation2 + $0x8] sm:$0xff] }
 0x21e   : > { %v2253_v43 = vadd.f32 %v2246_v41, %v2097_v28  ;;  %v2222_v47 = vpop.f32.mrf.mxu1 }
 0x224   : > { %v2235_v21 = vpop.f32.mrf.mxu2 }
 0x225   : > { %v2248_v7 = vpop.f32.mrf.mxu3 }
 0x226   : > { %v2376_v19 = vpop.f32.mrf.mxu1 }
 0x227   : > { %v2407_v56 = vadd.f32 %v2376_v19, %v2251_v40 }
 0x22c   : > { %v2389_v48 = vpop.f32.mrf.mxu2 }
 0x22d   : > { %v2402_v50 = vpop.f32.mrf.mxu3  ;;  %v2408_v25 = vadd.f32 %v2389_v48, %v2252_v17 }
 0x22e   : > { %v2378_v20 = vpop.f32.mrf.mxu1  ;;  %v2409_v6 = vadd.f32 %v2402_v50, %v2253_v43 }
 0x234   : > { %v2391_v27 = vpop.f32.mrf.mxu2 }
 0x235   : > { %v2404_v52 = vpop.f32.mrf.mxu3 }
 0x236   : > { %v2532_v55 = vpop.f32.mrf.mxu1 }
 0x237   : > { %v2563_v3 = vadd.f32 %v2532_v55, %v2407_v56 }
 0x23c   : > { %v2545_v58 = vpop.f32.mrf.mxu2 }
 0x23d   : > { %v2558_v46 = vpop.f32.mrf.mxu3  ;;  %v2564_v63 = vadd.f32 %v2545_v58, %v2408_v25 }
 0x23e   : > { %v2534_v39 = vpop.f32.mrf.mxu1  ;;  %v2565_v51 = vadd.f32 %v2558_v46, %v2409_v6 }
 0x244   : > { %v2547_v59 = vpop.f32.mrf.mxu2 }
 0x245   : > { %v2560_v60 = vpop.f32.mrf.mxu3 }
 0x246   : > { %v2688_v38 = vpop.f32.mrf.mxu1 }
 0x247   : > { %v2719_v44 = vadd.f32 %v2688_v38, %v2563_v3 }
 0x24c   : > { %v2701_v14 = vpop.f32.mrf.mxu2 }
 0x24d   : > { %v2714_v18 = vpop.f32.mrf.mxu3  ;;  %v2720_v23 = vadd.f32 %v2701_v14, %v2564_v63 }
 0x24e   : > { %v2690_v61 = vpop.f32.mrf.mxu1  ;;  %v2721_v53 = vadd.f32 %v2714_v18, %v2565_v51 }
 0x254   : > { %v2703_v30 = vpop.f32.mrf.mxu2 }
 0x255   : > { %v2716_v15 = vpop.f32.mrf.mxu3 }
 0x256   : > { %v2844_v22 = vpop.f32.mrf.mxu1 }
 0x257   : > { %v2875_v54 = vadd.f32 %v2844_v22, %v2719_v44 }
 0x25c   : > { %v2857_v9 = vpop.f32.mrf.mxu2 }
 0x25d   : > { %v2870_v1 = vpop.f32.mrf.mxu3  ;;  %v2876_v32 = vadd.f32 %v2857_v9, %v2720_v23 }
 0x25e   : > { %v2846_v2 = vpop.f32.mrf.mxu1  ;;  %v2877_v24 = vadd.f32 %v2870_v1, %v2721_v53 }
 0x264   : > { %v2859_v5 = vpop.f32.mrf.mxu2 }
 0x265   : > { %v2872_v0 = vpop.f32.mrf.mxu3 }
 0x266   : > { %v3000_v10 = vpop.f32.mrf.mxu1 }
 0x267   : > { %v3031_v57 = vadd.f32 %v3000_v10, %v2875_v54 }
 0x269   : > { %v3039_v49 = vadd.f32 %v3035_v13, %v3031_v57 }
 0x26b   : > { %3043 = vst [vmem:[#allocation2] sm:$0xff] %v3039_v49 }
 0x26c   : > { %v3013_v45 = vpop.f32.mrf.mxu2 }
 0x26d   : > { %v3032_v42 = vadd.f32 %v3013_v45, %v2876_v32  ;;  %v3026_v4 = vpop.f32.mrf.mxu3 }
 0x26e   : > { %v3033_v62 = vadd.f32 %v3026_v4, %v2877_v24  ;;  %v3002_v28 = vpop.f32.mrf.mxu1 }
 0x26f   : > { %v3040_v11 = vadd.f32 %v3036_v26, %v3032_v42 }
 0x270   : > { %v3041_v29 = vadd.f32 %v3037_v12, %v3033_v62 }
 0x271   : > { %3044 = vst [vmem:[#allocation2 + $0x18] sm:$0xff] %v3040_v11  ;;  %3049 = sbr.rel (%p4632_p1) target bundleno = 831 (0x33f), region = 80 }
 0x272   : > { %3045 = vst [vmem:[#allocation2 + $0x8] sm:$0xff] %v3041_v29 }
 0x274   : > { %v3015_v31 = vpop.f32.mrf.mxu2 }
 0x275   : > { %v3028_v33 = vpop.f32.mrf.mxu3 }
 0x276   : > { %v5028_v35 = vld [vmem:[#allocation9 + $0x38] sm:$0xff]  ;;  %v5027_v8 = vld [vmem:[#allocation9 + $0x30] sm:$0xff]  ;;  %v5026_v41 = vld [vmem:[#allocation9 + $0x28] sm:$0xff] }
 0x277   : > { %v5036_v36 = vld [vmem:[#allocation9 + $0x78] sm:$0xff]  ;;  %3336 = vmatpush.bf16.msra.mxu0 %v5028_v35  ;;  %v5035_v40 = vld [vmem:[#allocation9 + $0x70] sm:$0xff]  ;;  %v5034_v43 = vld [vmem:[#allocation9 + $0x68] sm:$0xff] }
 0x278   : > { %v5044_v34 = vld [vmem:[#allocation9 + $0xb8] sm:$0xff]  ;;  %3349 = vmatpush.bf16.msra.mxu1 %v5036_v36  ;;  %v5043_v16 = vld [vmem:[#allocation9 + $0xb0] sm:$0xff]  ;;  %v5042_v47 = vld [vmem:[#allocation9 + $0xa8] sm:$0xff] }
 0x279   : > { %v5052_v37 = vld [vmem:[#allocation9 + $0xf8] sm:$0xff]  ;;  %3362 = vmatpush.bf16.msra.mxu2 %v5044_v34  ;;  %v5051_v17 = vld [vmem:[#allocation9 + $0xf0] sm:$0xff]  ;;  %v5050_v21 = vld [vmem:[#allocation9 + $0xe8] sm:$0xff] }
 0x27a   : > { %3375 = vmatpush.bf16.msra.mxu3 %v5052_v37  ;;  %v5025_v7 = vld [vmem:[#allocation9 + $0x20] sm:$0xff]  ;;  %v5024_v20 = vld [vmem:[#allocation9 + $0x18] sm:$0xff]  ;;  %v5023_v46 = vld [vmem:[#allocation9 + $0x10] sm:$0xff] }
 0x27b   : > { %3337 = vmatpush.bf16.msra.mxu0 %v5027_v8  ;;  %v5033_v19 = vld [vmem:[#allocation9 + $0x60] sm:$0xff]  ;;  %v5032_v27 = vld [vmem:[#allocation9 + $0x58] sm:$0xff]  ;;  %v5031_v39 = vld [vmem:[#allocation9 + $0x50] sm:$0xff] }
 0x27c   : > { %3350 = vmatpush.bf16.msra.mxu1 %v5035_v40  ;;  %v5041_v48 = vld [vmem:[#allocation9 + $0xa0] sm:$0xff]  ;;  %v3054_v52 = vld [vmem:[#allocation8] sm:$0xf]  ;;  %v5039_v38 = vld [vmem:[#allocation9 + $0x90] sm:$0xff] }
 0x27d   : > { %3363 = vmatpush.bf16.msra.mxu2 %v5043_v16  ;;  %v5049_v50 = vld [vmem:[#allocation9 + $0xe0] sm:$0xff]  ;;  %v5040_v55 = vld [vmem:[#allocation9 + $0x98] sm:$0xff]  ;;  %v3056_v59 = vperm.slane %v3054_v52, 0  ;;  %v3057_v60 = vperm.slane %v3054_v52, 1  ;;  %v3051_v18 = vld [vmem:[#allocation2] sm:$0xff]  ;;  %v3058_v61 = vperm.slane %v3054_v52, 2 }
 0x27e   : > { %3376 = vmatpush.bf16.msra.mxu3 %v5051_v17  ;;  %v5048_v58 = vld [vmem:[#allocation9 + $0xd8] sm:$0xff]  ;;  %v3059_v30 = vperm.slane %v3054_v52, 3  ;;  %v5047_v15 = vld [vmem:[#allocation9 + $0xd0] sm:$0xff]  ;;  %v3052_v22 = vld [vmem:[#allocation2 + $0x18] sm:$0xff] }
 0x27f   : > { %3338 = vmatpush.bf16.msra.mxu0 %v5026_v41  ;;  %v3050_v14 = vld [vmem:[#allocation2 + $0x10] sm:$0xff]  ;;  %v3053_v9 = vld [vmem:[#allocation2 + $0x8] sm:$0xff]  ;;  %v3065_v2 = vadd.f32 %v3057_v60, %v3051_v18  ;;  %v5022_v56 = vld [vmem:[#allocation9 + $0x8] sm:$0xff]  ;;  %v3066_v44 = vadd.f32 %v3058_v61, %v3052_v22 }
 0x280   : > { %3351 = vmatpush.bf16.msra.mxu1 %v5034_v43  ;;  %v3064_v1 = vadd.f32 %v3056_v59, %v3050_v14  ;;  %v5030_v3 = vld [vmem:[#allocation9 + $0x48] sm:$0xff]  ;;  %v3067_v5 = vadd.f32 %v3059_v30, %v3053_v9  ;;  %v5021_v10 = vld [vmem:[#allocation9] sm:$0xff] }
 0x281   : > { %3364 = vmatpush.bf16.msra.mxu2 %v5042_v47  ;;  %v5038_v25 = vld [vmem:[#allocation9 + $0x88] sm:$0xff]  ;;  %v3069_v6 = vmax.f32 %v3065_v2, 0.0  ;;  %v5029_v13 = vld [vmem:[#allocation9 + $0x40] sm:$0xff]  ;;  %v3070_v63 = vmax.f32 %v3066_v44, 0.0 }
 0x282   : > { %3377 = vmatpush.bf16.msra.mxu3 %v5050_v21  ;;  %v5046_v54 = vld [vmem:[#allocation9 + $0xc8] sm:$0xff]  ;;  %v3068_v0 = vmax.f32 %v3064_v1, 0.0  ;;  %v3071_v57 = vmax.f32 %v3067_v5, 0.0  ;;  %v5037_v51 = vld [vmem:[#allocation9 + $0x80] sm:$0xff] }
 0x283   : > { %3339 = vmatpush.bf16.msra.mxu0 %v5025_v7  ;;  %v5045_v23 = vld [vmem:[#allocation9 + $0xc0] sm:$0xff]  ;;  %v3073_v53 = vpack.c.bf16 %v3069_v6, %v3069_v6  ;;  %v3074_v32 = vpack.c.bf16 %v3070_v63, %v3070_v63 }
 0x284   : > { %3352 = vmatpush.bf16.msra.mxu1 %v5033_v19  ;;  %v3072_v49 = vpack.c.bf16 %v3068_v0, %v3068_v0  ;;  %v3075_v24 = vpack.c.bf16 %v3071_v57, %v3071_v57  ;;  %v5152_v45 = vld [vmem:[#allocation11] ss:$0 sm:$0xff] }
 0x285   : > { %3365 = vmatpush.bf16.msra.mxu2 %v5041_v48 }
 0x286   : > { %3378 = vmatpush.bf16.msra.mxu3 %v5049_v50 }
 0x287   : > { %3340 = vmatpush.bf16.msra.mxu0 %v5024_v20 }
 0x288   : > { %3353 = vmatpush.bf16.msra.mxu1 %v5032_v27 }
 0x289   : > { %3366 = vmatpush.bf16.msra.mxu2 %v5040_v55 }
 0x28a   : > { %3379 = vmatpush.bf16.msra.mxu3 %v5048_v58 }
 0x28b   : > { %3341 = vmatpush.bf16.msra.mxu0 %v5023_v46 }
 0x28c   : > { %3354 = vmatpush.bf16.msra.mxu1 %v5031_v39 }
 0x28d   : > { %3367 = vmatpush.bf16.msra.mxu2 %v5039_v38 }
 0x28e   : > { %3380 = vmatpush.bf16.msra.mxu3 %v5047_v15 }
 0x28f   : > { %3342 = vmatpush.bf16.msra.mxu0 %v5022_v56 }
 0x290   : > { %3355 = vmatpush.bf16.msra.mxu1 %v5030_v3 }
 0x291   : > { %3368 = vmatpush.bf16.msra.mxu2 %v5038_v25 }
 0x292   : > { %3381 = vmatpush.bf16.msra.mxu3 %v5046_v54 }
 0x293   : > { %3343 = vmatpush.bf16.msra.mxu0 %v5021_v10 }
 0x294   : > { %3356 = vmatpush.bf16.msra.mxu1 %v5029_v13 }
 0x295   : > { %3369 = vmatpush.bf16.msra.mxu2 %v5037_v51 }
 0x296   : > { %3382 = vmatpush.bf16.msra.mxu3 %v5045_v23  ;;  %3344 = vmatmul.bf16.vlgmr.msra.gmra.mxu0 %v3072_v49 }
 0x297   : > { %3357 = vmatmul.bf16.vlgmr.msra.gmra.mxu1 %v3073_v53 }
 0x298   : > { %3370 = vmatmul.bf16.vlgmr.msra.gmra.mxu2 %v3074_v32 }
 0x299   : > { %3383 = vmatmul.bf16.vlgmr.msra.gmra.mxu3 %v3075_v24 }
 0x313   : > { %v3345_v26 = vpop.f32.mrf.mxu0 }
 0x314   : > { %v3358_v42 = vpop.f32.mrf.mxu1  ;;  %v3346_v4 = vadd.f32 %v5152_v45, %v3345_v26 }
 0x316   : > { %v3359_v12 = vadd.f32 %v3358_v42, %v3346_v4 }
 0x31b   : > { %v3371_v62 = vpop.f32.mrf.mxu2  ;;  %v3347_v29 = vpop.f32.mrf.mxu0 }
 0x31c   : > { %v3384_v28 = vpop.f32.mrf.mxu3  ;;  %v3372_v11 = vadd.f32 %v3371_v62, %v3359_v12  ;;  %v3360_v31 = vpop.f32.mrf.mxu1 }
 0x31e   : > { %v3385_v33 = vadd.f32 %v3384_v28, %v3372_v11 }
 0x320   : > { %v3388_v35 = vsub.f32 0.0, %v3385_v33 }
 0x322   : > { %v3389_v36 = vmul.f32 1.442695, %v3388_v35 }
 0x323   : > { %v3373_v34 = vpop.f32.mrf.mxu2 }
 0x324   : > { %v3386_v37 = vpop.f32.mrf.mxu3  ;;  %5153 = vpow2.f32 %v3389_v36 }
 0x32a   : > { %v5154_v8 = vpop.eup %5153 }
 0x32b   : > { %v3391_v40 = vadd.f32 1.0, %v5154_v8 }
 0x32d   : > { %5155 = vrcp.f32 %v3391_v40  ;;  %v3403_v43 = vand.u32 2147483648, %v3391_v40  ;;  %v3401_v21 = vand.u32 2147483647, %v3391_v40  ;;  %vm3397_vm3 = vweird.f32 %v3391_v40 }
 0x32f   : > { %v3404_v19 = vor.u32 1.1754944e-38, %v3403_v43  ;;  %vm3402_vm5 = vcmp.eq.f32.partialorder %v3401_v21, 8.507059e+37 }
 0x333   : > { %v5156_v16 = vpop.eup %5155 }
 0x334   : > { %v3393_v17 = vmul.f32 %v5156_v16, %v3391_v40  ;;  %vm3398_vm2 = vweird.f32 %v5156_v16 }
 0x335   : > { %vm3399_vm4 = vmor %vm3397_vm3, %vm3398_vm2 }
 0x336   : > { %v3394_v41 = vsub.f32 1.0, %v3393_v17 }
 0x338   : > { %v3395_v47 = vmul.f32 %v5156_v16, %v3394_v41 }
 0x33a   : > { %v3396_v7 = vadd.f32 %v5156_v16, %v3395_v47 }
 0x33c   : > { %v3400_v48 = vsel %vm3399_vm4, %v5156_v16, %v3396_v7 }
 0x33d   : > { %v3405_v50 = vsel %vm3402_vm5, %v3404_v19, %v3400_v48 }
 0x33e   : > { %3407 = vst [vmem:[%s6420_s7] sm:$0xff] %v3405_v50 }
 0x33f PF: > { %p17_p4 = scmp.ge.s32.totalorder %s5509_s22, 6   ;;  %s6425_s24 = smov %s5379_s25 }
 0x340   : > { %s6426_s25 = smov %s5383_s26  ;;  %s6427_s26 = smov %s5521_s30 }
 0x341   : > { %s6428_s27 = smov %s5509_s22  ;;  %19 = sbr.rel (!%p17_p4) target bundleno = 4 (0x4), region = 114 }
 0x346   :  { %3419 = vsyncpa [#allocation4], 1 }
 0x347   :  { %3421 = vsyncpa [#allocation4 + $0x1], 1 }
 0x348   :  { %3422 = vsyncpa [#allocation6], 1 }
 0x349   :  { %3423 = vsyncpa [#allocation10], 1 }

</bundles_post_ra>
